<compile_context>
chip_gen: v7x
topology: tpu7x:2x2x1
jax: 0.10.0
libtpu: 0.0.40
codegen_flags: <defaults>
</compile_context>

<pallas_src>
import functools
import math

import jax
import jax.numpy as jnp
from jax import lax
from jax.experimental import pallas as pl
from jax.experimental.pallas import tpu as pltpu

LN_EPS = 1e-6
NEG_MASK = -1e30   # finite additive mask: bias + mask stays finite (no NaN in exp)


def t5_layernorm(x, w, eps=LN_EPS):
    # T5 style: no mean subtraction, no bias; computed in f32.
    var = jnp.mean(x * x, axis=-1, keepdims=True)
    return w * (x * lax.rsqrt(var + eps))


# ---------------------------------------------------------------------------
# fused decoder kernel: grid = (depth,), residual stays VMEM-resident
# ---------------------------------------------------------------------------
def _t5_decoder_kernel(x0_ref, ctx_ref, bias_ref, causal_ref, fln_ref,
                       sa_ln, sa_wq, sa_wk, sa_wv, sa_wo,
                       ca_ln, ca_wq, ca_wk, ca_wv, ca_wo,
                       ff_ln, ff_wi0, ff_wi1, ff_wo,
                       o_ref, acc_ref, *, batch, seq_q, seq_kv, heads, dim_head):
    layer = pl.program_id(0)
    last = pl.num_programs(0) - 1

    @pl.when(layer == 0)
    def _():
        acc_ref[...] = x0_ref[...]        # load embedded tokens once

    x = acc_ref[...]                      # (B*S, D) f32 residual (VMEM-resident)
    ctx = ctx_ref[...]                    # (B*Sc, Dc) bf16

    # Additive score bias for self-attention: causal mask every layer, the
    # (already scale-multiplied) relative-position bias only on layer 0.
    gate = jnp.where(layer == 0, 1.0, 0.0)
    sa_addend = causal_ref[...] + gate * bias_ref[...]          # (H, S, S) f32

    def attention(xq_n, kv, s_kv, wq_ref, wk_ref, wv_ref, wo_ref, addend):
        # Projections on the full (B*S, D) slab (batch folded into M).
        q = jnp.dot(xq_n, wq_ref[0],
                    preferred_element_type=jnp.float32).astype(jnp.bfloat16)
        k = jnp.dot(kv, wk_ref[0],
                    preferred_element_type=jnp.float32).astype(jnp.bfloat16)
        v = jnp.dot(kv, wv_ref[0],
                    preferred_element_type=jnp.float32).astype(jnp.bfloat16)
        wo = wo_ref[0]                                          # (H*Dh, D) bf16
        out_rows = []
        # TODO(synk): at production S, replace this per-(b, h) loop with a
        # head / q-tile grid axis + flash-style online-softmax k-tiling.
        for b in range(batch):
            rq = slice(b * seq_q, (b + 1) * seq_q)
            rk = slice(b * s_kv, (b + 1) * s_kv)
            acc = None
            for h in range(heads):
                cs = slice(h * dim_head, (h + 1) * dim_head)
                sim = lax.dot_general(
                    q[rq, cs], k[rk, cs],
                    dimension_numbers=(((1,), (1,)), ((), ())),
                    preferred_element_type=jnp.float32)         # (S, Skv) f32
                if addend is not None:
                    sim = sim + addend[h]
                m = jnp.max(sim, axis=-1, keepdims=True)
                e = jnp.exp(sim - m)
                r = pl.reciprocal(jnp.sum(e, axis=-1, keepdims=True), approx=True)
                attn = (e * r).astype(jnp.bfloat16)
                pv = jnp.dot(attn, v[rk, cs],
                             preferred_element_type=jnp.float32).astype(jnp.bfloat16)
                # Fold the output projection per head:
                #   sum_h pv_h @ wo[h*Dh:(h+1)*Dh]  ==  concat_h(pv_h) @ wo
                # -> no lane-axis concat / masked-store slab assembly.
                contrib = jnp.dot(pv, wo[cs, :],
                                  preferred_element_type=jnp.float32)
                acc = contrib if acc is None else acc + contrib
            out_rows.append(acc)                                 # (S, D) f32
        return jnp.concatenate(out_rows, axis=0)                 # (B*S, D) f32

    # --- self-attention (pre-LN, causal, rel-pos bias on layer 0 only) ---
    xn = t5_layernorm(x, sa_ln[0]).astype(jnp.bfloat16)
    x = x + attention(xn, xn, seq_q, sa_wq, sa_wk, sa_wv, sa_wo, sa_addend)

    # --- cross-attention (context NOT normalized, matching torch PreNorm) ---
    xn = t5_layernorm(x, ca_ln[0]).astype(jnp.bfloat16)
    x = x + attention(xn, ctx, seq_kv, ca_wq, ca_wk, ca_wv, ca_wo, None)

    # --- gated-ReLU feed-forward ---
    # TODO(synk): at production ff widths, tile the inner dimension and
    # accumulate chunk contributions instead of full (B*S, ff) intermediates.
    xn = t5_layernorm(x, ff_ln[0]).astype(jnp.bfloat16)
    h_relu = jnp.maximum(
        jnp.dot(xn, ff_wi0[0], preferred_element_type=jnp.float32), 0.0)
    h_lin = jnp.dot(xn, ff_wi1[0], preferred_element_type=jnp.float32)
    x = x + jnp.dot((h_relu * h_lin).astype(jnp.bfloat16), ff_wo[0],
                    preferred_element_type=jnp.float32)

    acc_ref[...] = x

    @pl.when(layer == last)
    def _():
        o_ref[...] = t5_layernorm(x, fln_ref[...])               # fused final LN


# ---------------------------------------------------------------------------
# host wrapper
# ---------------------------------------------------------------------------
_LAYER_PARAMS = ('sa_ln', 'sa_wq', 'sa_wk', 'sa_wv', 'sa_wo',
                 'ca_ln', 'ca_wq', 'ca_wk', 'ca_wv', 'ca_wo',
                 'ff_ln', 'ff_wi0', 'ff_wi1', 'ff_wo')


def _nbytes(shape, dtype):
    n = 1
    for s in shape:
        n *= int(s)
    return n * jnp.dtype(dtype).itemsize


def relative_position_bias(rel_emb, seq_q, seq_k, scale, *, causal=True,
                           num_buckets=32, max_distance=128):
    # T5 bucket math (integer) stays in plain JAX.
    q_pos = jnp.arange(seq_k - seq_q, seq_k)
    k_pos = jnp.arange(seq_k)
    rel_pos = k_pos[None, :] - q_pos[:, None]
    n = -rel_pos
    if causal:
        nb = num_buckets
        ret = jnp.zeros_like(n)
        n = jnp.maximum(n, 0)
    else:
        nb = num_buckets // 2
        ret = (n < 0).astype(jnp.int32) * nb
        n = jnp.abs(n)
    max_exact = nb // 2
    is_small = n < max_exact
    safe_n = jnp.maximum(n, 1).astype(jnp.float32)
    val_if_large = max_exact + (
        jnp.log(safe_n / max_exact) / math.log(max_distance / max_exact)
        * (nb - max_exact)).astype(jnp.int32)
    val_if_large = jnp.minimum(val_if_large, nb - 1)
    bucket = ret + jnp.where(is_small, n, val_if_large)          # (i, j)
    values = rel_emb[bucket]                                     # (i, j, H)
    return jnp.transpose(values, (2, 0, 1)) * scale              # (H, i, j)


def t5_decoder_forward(params, tokens, context, *, heads, dim_head):
    # TODO(synk): token-embedding gather stays in plain JAX (no clean Pallas
    # equivalent needed at this granularity); dropout(p=0) is identity.
    x = jnp.take(params['token_emb'], tokens, axis=0)            # (B, S, D) f32
    B, S, D = x.shape
    _, Sc, Dc = context.shape
    depth = params['sa_wq'].shape[0]
    scale = dim_head ** -0.5

    x_slab = x.reshape(B * S, D)                                 # batch folded into M
    ctx_slab = context.astype(jnp.bfloat16).reshape(B * Sc, Dc)

    # layer-0 relative-position bias (already * scale) + additive causal mask
    rel_bias = relative_position_bias(params['rel_emb'], S, S, scale, causal=True)
    row = lax.broadcasted_iota(jnp.int32, (1, S, S), 1)
    col = lax.broadcasted_iota(jnp.int32, (1, S, S), 2)
    causal_add = jnp.where(col > row, NEG_MASK, 0.0).astype(jnp.float32)

    weight_args = [params[name] for name in _LAYER_PARAMS]

    def const_spec(shape):                    # resident across all layers
        n = len(shape)
        return pl.BlockSpec(shape, lambda d, n=n: (0,) * n)

    def layer_spec(arr):                      # one layer's block, prefetched
        n = arr.ndim
        return pl.BlockSpec((1,) + tuple(arr.shape[1:]),
                            lambda d, n=n: (d,) + (0,) * (n - 1))

    in_specs = ([const_spec(x_slab.shape), const_spec(ctx_slab.shape),
                 const_spec(rel_bias.shape), const_spec(causal_add.shape),
                 const_spec(params['final_ln'].shape)]
                + [layer_spec(w) for w in weight_args])
    out_spec = const_spec((B * S, D))

    # VMEM budget from the real block footprint (double buffers + headroom).
    block_bytes = (_nbytes(x_slab.shape, x_slab.dtype)
                   + _nbytes(ctx_slab.shape, ctx_slab.dtype)
                   + _nbytes(rel_bias.shape, rel_bias.dtype)
                   + _nbytes(causal_add.shape, causal_add.dtype)
                   + _nbytes(params['final_ln'].shape, params['final_ln'].dtype)
                   + sum(_nbytes(w.shape[1:], w.dtype) for w in weight_args)
                   + 2 * _nbytes((B * S, D), jnp.float32))
    vmem_limit = int(min(max(8 * block_bytes, 32 << 20), 100 << 20))

    kernel = functools.partial(_t5_decoder_kernel, batch=B, seq_q=S, seq_kv=Sc,
                               heads=heads, dim_head=dim_head)
    out = pl.pallas_call(
        kernel,
        out_shape=jax.ShapeDtypeStruct((B * S, D), jnp.float32),
        grid=(depth,),
        in_specs=in_specs,
        out_specs=out_spec,
        scratch_shapes=[pltpu.VMEM((B * S, D), jnp.float32)],    # residual stream
        compiler_params=pltpu.CompilerParams(
            dimension_semantics=("arbitrary",),
            vmem_limit_bytes=vmem_limit),
    )(x_slab, ctx_slab, rel_bias, causal_add, params['final_ln'], *weight_args)
    return out.reshape(B, S, D)


# ---------------------------------------------------------------------------
# pure-JAX reference with the SAME mixed precision as the kernel
# ---------------------------------------------------------------------------
def ref_forward(params, tokens, context, *, heads, dim_head):
    # NOTE: 1/sqrt(dim_head) is folded into the stored q-projection weights,
    # which matches torch's post-projection `q = q * scale` exactly here
    # (scale = 0.25 is a power of two).
    x = params['token_emb'][tokens]                              # (B, S, D) f32
    B, S, D = x.shape
    ctx = context.astype(jnp.bfloat16)
    scale = dim_head ** -0.5
    depth = params['sa_wq'].shape[0]
    rel_bias = relative_position_bias(params['rel_emb'], S, S, scale, causal=True)
    mask_value = -jnp.finfo(jnp.float32).max

    def split(t):
        b, s, _ = t.shape
        return (t.reshape(b, s, heads, dim_head)
                 .transpose(0, 2, 1, 3).astype(jnp.bfloat16))

    def mha(xn, kv, wq, wk, wv, wo, bias, causal):
        q = jnp.einsum('bsd,de->bse', xn, wq, preferred_element_type=jnp.float32)
        k = jnp.einsum('bsd,de->bse', kv, wk, preferred_element_type=jnp.float32)
        v = jnp.einsum('bsd,de->bse', kv, wv, preferred_element_type=jnp.float32)
        qh, kh, vh = split(q), split(k), split(v)
        sim = jnp.einsum('bhqd,bhkd->bhqk', qh, kh,
                         preferred_element_type=jnp.float32)
        if bias is not None:
            sim = sim + bias[None]
        if causal:
            i, j = sim.shape[-2:]
            cm = jnp.triu(jnp.ones((i, j), bool), j - i + 1)
            sim = jnp.where(cm, mask_value, sim)
        attn = jax.nn.softmax(sim, axis=-1).astype(jnp.bfloat16)
        out = jnp.einsum('bhqk,bhkd->bhqd', attn, vh,
                         preferred_element_type=jnp.float32)
        out = (out.transpose(0, 2, 1, 3)
                  .reshape(B, -1, heads * dim_head).astype(jnp.bfloat16))
        return jnp.einsum('bse,ed->bsd', out, wo,
                          preferred_element_type=jnp.float32)

    for i in range(depth):
        xn = t5_layernorm(x, params['sa_ln'][i]).astype(jnp.bfloat16)
        x = x + mha(xn, xn, params['sa_wq'][i], params['sa_wk'][i],
                    params['sa_wv'][i], params['sa_wo'][i],
                    rel_bias if i == 0 else None, True)
        xn = t5_layernorm(x, params['ca_ln'][i]).astype(jnp.bfloat16)
        x = x + mha(xn, ctx, params['ca_wq'][i], params['ca_wk'][i],
                    params['ca_wv'][i], params['ca_wo'][i], None, False)
        xn = t5_layernorm(x, params['ff_ln'][i]).astype(jnp.bfloat16)
        hr = jnp.maximum(jnp.einsum('bsd,df->bsf', xn, params['ff_wi0'][i],
                                    preferred_element_type=jnp.float32), 0.0)
        hl = jnp.einsum('bsd,df->bsf', xn, params['ff_wi1'][i],
                        preferred_element_type=jnp.float32)
        x = x + jnp.einsum('bsf,fd->bsd', (hr * hl).astype(jnp.bfloat16),
                           params['ff_wo'][i], preferred_element_type=jnp.float32)
    return t5_layernorm(x, params['final_ln'])


# ---------------------------------------------------------------------------
# deterministic parameter init (stacked over depth, matmul weights in bf16)
# ---------------------------------------------------------------------------
def init_params(key, *, num_tokens, dim, depth, heads, dim_head, mlp_mult,
                num_buckets=32):
    inner = heads * dim_head
    ff = dim * mlp_mult
    scale = dim_head ** -0.5          # folded into the q projections at init
    keys = iter(jax.random.split(key, 2 + depth * 11))

    def w(shape, s=0.02, dtype=jnp.bfloat16, pre=1.0):
        v = jax.random.normal(next(keys), shape, jnp.float32) * (s * pre)
        return v.astype(dtype)

    def stack(make):
        return jnp.stack([make() for _ in range(depth)], axis=0)

    return {
        'token_emb': w((num_tokens, dim), 1.0, jnp.float32),
        'rel_emb': w((num_buckets, heads), 0.1, jnp.float32),
        'final_ln': jnp.ones((1, dim), jnp.float32),
        # per-layer weights stacked along a leading depth axis (the grid axis)
        'sa_ln': jnp.ones((depth, 1, dim), jnp.float32),
        'sa_wq': stack(lambda: w((dim, inner), pre=scale)),   # q-scale folded in
        'sa_wk': stack(lambda: w((dim, inner))),
        'sa_wv': stack(lambda: w((dim, inner))),
        'sa_wo': stack(lambda: w((inner, dim))),
        'ca_ln': jnp.ones((depth, 1, dim), jnp.float32),
        'ca_wq': stack(lambda: w((dim, inner), pre=scale)),   # q-scale folded in
        'ca_wk': stack(lambda: w((dim, inner))),
        'ca_wv': stack(lambda: w((dim, inner))),
        'ca_wo': stack(lambda: w((inner, dim))),
        'ff_ln': jnp.ones((depth, 1, dim), jnp.float32),
        'ff_wi0': stack(lambda: w((dim, ff))),
        'ff_wi1': stack(lambda: w((dim, ff))),
        'ff_wo': stack(lambda: w((ff, dim))),
    }


if __name__ == "__main__":
    # small config: dim=32, heads=2, dim_head=16, depth=2, num_tokens=100
    dim, heads, dim_head, depth, num_tokens, mlp_mult = 32, 2, 16, 2, 100, 4
    B, S, Sc = 2, 8, 8

    key = jax.random.PRNGKey(0)
    kp, kt, kc = jax.random.split(key, 3)
    params = init_params(kp, num_tokens=num_tokens, dim=dim, depth=depth,
                         heads=heads, dim_head=dim_head, mlp_mult=mlp_mult)
    tokens = jax.random.randint(kt, (B, S), 0, num_tokens, dtype=jnp.int32)
    context = jax.random.normal(kc, (B, Sc, dim), jnp.float32)

    fwd = jax.jit(functools.partial(t5_decoder_forward,
                                    heads=heads, dim_head=dim_head))
    out = jax.block_until_ready(fwd(params, tokens, context))
    assert out.shape == (B, S, dim), out.shape

    ref = jax.block_until_ready(
        ref_forward(params, tokens, context, heads=heads, dim_head=dim_head))
    err = float(jnp.max(jnp.abs(out - ref)))
    assert jnp.allclose(out, ref, atol=3e-3, rtol=3e-3), err

    print("KERNEL_OK")
</pallas_src>

<mosaic_0001>
module attributes {stable_mosaic.version = 11 : i64} {
  func.func @_t5_decoder_kernel(%arg0: i32, %arg1: memref<16x32xf32, #tpu.memory_space<vmem>>, %arg2: memref<16x32xbf16, #tpu.memory_space<vmem>>, %arg3: memref<2x8x8xf32, #tpu.memory_space<vmem>>, %arg4: memref<1x8x8xf32, #tpu.memory_space<vmem>>, %arg5: memref<1x32xf32, #tpu.memory_space<vmem>>, %arg6: memref<1x1x32xf32, #tpu.memory_space<vmem>>, %arg7: memref<1x32x32xbf16, #tpu.memory_space<vmem>>, %arg8: memref<1x32x32xbf16, #tpu.memory_space<vmem>>, %arg9: memref<1x32x32xbf16, #tpu.memory_space<vmem>>, %arg10: memref<1x32x32xbf16, #tpu.memory_space<vmem>>, %arg11: memref<1x1x32xf32, #tpu.memory_space<vmem>>, %arg12: memref<1x32x32xbf16, #tpu.memory_space<vmem>>, %arg13: memref<1x32x32xbf16, #tpu.memory_space<vmem>>, %arg14: memref<1x32x32xbf16, #tpu.memory_space<vmem>>, %arg15: memref<1x32x32xbf16, #tpu.memory_space<vmem>>, %arg16: memref<1x1x32xf32, #tpu.memory_space<vmem>>, %arg17: memref<1x32x128xbf16, #tpu.memory_space<vmem>>, %arg18: memref<1x32x128xbf16, #tpu.memory_space<vmem>>, %arg19: memref<1x128x32xbf16, #tpu.memory_space<vmem>>, %arg20: memref<16x32xf32, #tpu.memory_space<vmem>>, %arg21: memref<16x32xf32, #tpu.memory_space<vmem>>) attributes {dimension_semantics = [#tpu.dimension_semantics<arbitrary>], iteration_bounds = array<i64: 2>, scalar_prefetch = 0 : i64, scratch_operands = 1 : i64, tpu.core_type = #tpu.core_type<tc>, window_params = [{pipeline_mode = #tpu.pipeline_mode<synchronous>, transform_indices = @transform_0, window_bounds = array<i64: 16, 32>}, {pipeline_mode = #tpu.pipeline_mode<synchronous>, transform_indices = @transform_1, window_bounds = array<i64: 16, 32>}, {pipeline_mode = #tpu.pipeline_mode<synchronous>, transform_indices = @transform_2, window_bounds = array<i64: 2, 8, 8>}, {pipeline_mode = #tpu.pipeline_mode<synchronous>, transform_indices = @transform_3, window_bounds = array<i64: 1, 8, 8>}, {pipeline_mode = #tpu.pipeline_mode<synchronous>, transform_indices = @transform_4, window_bounds = array<i64: 1, 32>}, {transform_indices = @transform_5, window_bounds = array<i64: 1, 1, 32>}, {transform_indices = @transform_6, window_bounds = array<i64: 1, 32, 32>}, {transform_indices = @transform_7, window_bounds = array<i64: 1, 32, 32>}, {transform_indices = @transform_8, window_bounds = array<i64: 1, 32, 32>}, {transform_indices = @transform_9, window_bounds = array<i64: 1, 32, 32>}, {transform_indices = @transform_10, window_bounds = array<i64: 1, 1, 32>}, {transform_indices = @transform_11, window_bounds = array<i64: 1, 32, 32>}, {transform_indices = @transform_12, window_bounds = array<i64: 1, 32, 32>}, {transform_indices = @transform_13, window_bounds = array<i64: 1, 32, 32>}, {transform_indices = @transform_14, window_bounds = array<i64: 1, 32, 32>}, {transform_indices = @transform_15, window_bounds = array<i64: 1, 1, 32>}, {transform_indices = @transform_16, window_bounds = array<i64: 1, 32, 128>}, {transform_indices = @transform_17, window_bounds = array<i64: 1, 32, 128>}, {transform_indices = @transform_18, window_bounds = array<i64: 1, 128, 32>}, {pipeline_mode = #tpu.pipeline_mode<synchronous>, transform_indices = @transform_19, window_bounds = array<i64: 16, 32>}]} {
    %c0_i32 = arith.constant 0 : i32
    %0 = arith.cmpi eq, %arg0, %c0_i32 : i32
    %1 = arith.extui %0 : i1 to i32
    %c0_i32_0 = arith.constant 0 : i32
    %2 = arith.cmpi ne, %1, %c0_i32_0 : i32
    scf.if %2 {
      %c0_116 = arith.constant 0 : index
      %c0_117 = arith.constant 0 : index
      %276 = vector.load %arg1[%c0_116, %c0_117] : memref<16x32xf32, #tpu.memory_space<vmem>>, vector<16x32xf32>
      %c0_118 = arith.constant 0 : index
      %c0_119 = arith.constant 0 : index
      %277 = vector.load %arg21[%c0_118, %c0_119] : memref<16x32xf32, #tpu.memory_space<vmem>>, vector<16x32xf32>
      tpu.vector_store %arg21[%c0_118, %c0_119], %276 {strides = array<i32>} : memref<16x32xf32, #tpu.memory_space<vmem>>, vector<16x32xf32>,
    } else {
    }
    %c0 = arith.constant 0 : index
    %c0_1 = arith.constant 0 : index
    %3 = vector.load %arg21[%c0, %c0_1] : memref<16x32xf32, #tpu.memory_space<vmem>>, vector<16x32xf32>
    %c0_2 = arith.constant 0 : index
    %c0_3 = arith.constant 0 : index
    %4 = vector.load %arg2[%c0_2, %c0_3] : memref<16x32xbf16, #tpu.memory_space<vmem>>, vector<16x32xbf16>
    %c0_i32_4 = arith.constant 0 : i32
    %5 = arith.cmpi eq, %arg0, %c0_i32_4 : i32
    %cst = arith.constant 1.000000e+00 : f32
    %cst_5 = arith.constant 0.000000e+00 : f32
    %6 = arith.select %5, %cst, %cst_5 : f32
    %c0_6 = arith.constant 0 : index
    %c0_7 = arith.constant 0 : index
    %c0_8 = arith.constant 0 : index
    %7 = vector.load %arg4[%c0_6, %c0_7, %c0_8] : memref<1x8x8xf32, #tpu.memory_space<vmem>>, vector<1x8x8xf32>
    %c0_9 = arith.constant 0 : index
    %c0_10 = arith.constant 0 : index
    %c0_11 = arith.constant 0 : index
    %8 = vector.load %arg3[%c0_9, %c0_10, %c0_11] : memref<2x8x8xf32, #tpu.memory_space<vmem>>, vector<2x8x8xf32>
    %9 = vector.broadcast %6 : f32 to vector<2x8x8xf32>
    %10 = arith.mulf %9, %8 : vector<2x8x8xf32>
    %11 = vector.broadcast %7 : vector<1x8x8xf32> to vector<2x8x8xf32>
    %12 = arith.addf %11, %10 : vector<2x8x8xf32>
    %c0_12 = arith.constant 0 : index
    %c0_13 = arith.constant 0 : index
    %c0_14 = arith.constant 0 : index
    %13 = vector.load %arg6[%c0_12, %c0_13, %c0_14] : memref<1x1x32xf32, #tpu.memory_space<vmem>>, vector<1x1x32xf32>
    %14 = vector.shape_cast %13 : vector<1x1x32xf32> to vector<1x32xf32>
    %15 = arith.mulf %3, %3 : vector<16x32xf32>
    %cst_15 = arith.constant dense<0.000000e+00> : vector<16xf32>
    %16 = vector.multi_reduction <add>, %15, %cst_15 [1] : vector<16x32xf32> to vector<16xf32>
    %17 = vector.shape_cast %16 : vector<16xf32> to vector<16x1xf32>
    %cst_16 = arith.constant 3.200000e+01 : f32
    %18 = vector.broadcast %cst_16 : f32 to vector<16x1xf32>
    %19 = arith.divf %17, %18 : vector<16x1xf32>
    %cst_17 = arith.constant 9.99999997E-7 : f32
    %20 = vector.broadcast %cst_17 : f32 to vector<16x1xf32>
    %21 = arith.addf %19, %20 : vector<16x1xf32>
    %22 = math.rsqrt %21 : vector<16x1xf32>
    %23 = vector.broadcast %22 : vector<16x1xf32> to vector<16x32xf32>
    %24 = arith.mulf %3, %23 : vector<16x32xf32>
    %25 = vector.broadcast %14 : vector<1x32xf32> to vector<16x32xf32>
    %26 = arith.mulf %25, %24 : vector<16x32xf32>
    %27 = arith.truncf %26 : vector<16x32xf32> to vector<16x32xbf16>
    %c0_18 = arith.constant 0 : index
    %c0_19 = arith.constant 0 : index
    %c0_20 = arith.constant 0 : index
    %28 = vector.load %arg7[%c0_18, %c0_19, %c0_20] : memref<1x32x32xbf16, #tpu.memory_space<vmem>>, vector<1x32x32xbf16>
    %29 = vector.shape_cast %28 : vector<1x32x32xbf16> to vector<32x32xbf16>
    %cst_21 = arith.constant dense<0.000000e+00> : vector<16x32xf32>
    %30 = tpu.matmul %27, %29, %cst_21 {dimension_numbers = #tpu.dot_dimension_numbers<[1], [0], [0], [1], [0, 0, 1, 1], [], []>} : vector<16x32xbf16>, vector<32x32xbf16>, vector<16x32xf32> -> vector<16x32xf32>
    %31 = arith.truncf %30 : vector<16x32xf32> to vector<16x32xbf16>
    %c0_22 = arith.constant 0 : index
    %c0_23 = arith.constant 0 : index
    %c0_24 = arith.constant 0 : index
    %32 = vector.load %arg8[%c0_22, %c0_23, %c0_24] : memref<1x32x32xbf16, #tpu.memory_space<vmem>>, vector<1x32x32xbf16>
    %33 = vector.shape_cast %32 : vector<1x32x32xbf16> to vector<32x32xbf16>
    %cst_25 = arith.constant dense<0.000000e+00> : vector<16x32xf32>
    %34 = tpu.matmul %27, %33, %cst_25 {dimension_numbers = #tpu.dot_dimension_numbers<[1], [0], [0], [1], [0, 0, 1, 1], [], []>} : vector<16x32xbf16>, vector<32x32xbf16>, vector<16x32xf32> -> vector<16x32xf32>
    %35 = arith.truncf %34 : vector<16x32xf32> to vector<16x32xbf16>
    %c0_26 = arith.constant 0 : index
    %c0_27 = arith.constant 0 : index
    %c0_28 = arith.constant 0 : index
    %36 = vector.load %arg9[%c0_26, %c0_27, %c0_28] : memref<1x32x32xbf16, #tpu.memory_space<vmem>>, vector<1x32x32xbf16>
    %37 = vector.shape_cast %36 : vector<1x32x32xbf16> to vector<32x32xbf16>
    %cst_29 = arith.constant dense<0.000000e+00> : vector<16x32xf32>
    %38 = tpu.matmul %27, %37, %cst_29 {dimension_numbers = #tpu.dot_dimension_numbers<[1], [0], [0], [1], [0, 0, 1, 1], [], []>} : vector<16x32xbf16>, vector<32x32xbf16>, vector<16x32xf32> -> vector<16x32xf32>
    %39 = arith.truncf %38 : vector<16x32xf32> to vector<16x32xbf16>
    %c0_30 = arith.constant 0 : index
    %c0_31 = arith.constant 0 : index
    %c0_32 = arith.constant 0 : index
    %40 = vector.load %arg10[%c0_30, %c0_31, %c0_32] : memref<1x32x32xbf16, #tpu.memory_space<vmem>>, vector<1x32x32xbf16>
    %41 = vector.shape_cast %40 : vector<1x32x32xbf16> to vector<32x32xbf16>
    %42 = vector.extract_strided_slice %31 {offsets = [0, 0], sizes = [8, 16], strides = [1, 1]} : vector<16x32xbf16> to vector<8x16xbf16>
    %43 = vector.extract_strided_slice %35 {offsets = [0, 0], sizes = [8, 16], strides = [1, 1]} : vector<16x32xbf16> to vector<8x16xbf16>
    %cst_33 = arith.constant dense<0.000000e+00> : vector<8x8xf32>
    %44 = tpu.matmul %42, %43, %cst_33 {dimension_numbers = #tpu.dot_dimension_numbers<[1], [1], [0], [0], [0, 0, 1, 0], [], []>} : vector<8x16xbf16>, vector<8x16xbf16>, vector<8x8xf32> -> vector<8x8xf32>
    %45 = vector.extract_strided_slice %12 {offsets = [0, 0, 0], sizes = [1, 8, 8], strides = [1, 1, 1]} : vector<2x8x8xf32> to vector<1x8x8xf32>
    %46 = vector.shape_cast %45 : vector<1x8x8xf32> to vector<8x8xf32>
    %47 = arith.addf %44, %46 : vector<8x8xf32>
    %cst_34 = arith.constant dense<0xFF800000> : vector<8xf32>
    %48 = vector.multi_reduction <maximumf>, %47, %cst_34 [1] : vector<8x8xf32> to vector<8xf32>
    %49 = vector.shape_cast %48 : vector<8xf32> to vector<8x1xf32>
    %50 = vector.broadcast %49 : vector<8x1xf32> to vector<8x8xf32>
    %51 = arith.subf %47, %50 : vector<8x8xf32>
    %52 = math.exp %51 : vector<8x8xf32>
    %cst_35 = arith.constant dense<0.000000e+00> : vector<8xf32>
    %53 = vector.multi_reduction <add>, %52, %cst_35 [1] : vector<8x8xf32> to vector<8xf32>
    %54 = vector.shape_cast %53 : vector<8xf32> to vector<8x1xf32>
    %55 = tpu.reciprocal %54 {approx = true} : vector<8x1xf32> -> vector<8x1xf32>
    %56 = vector.broadcast %55 : vector<8x1xf32> to vector<8x8xf32>
    %57 = arith.mulf %52, %56 : vector<8x8xf32>
    %58 = arith.truncf %57 : vector<8x8xf32> to vector<8x8xbf16>
    %59 = vector.extract_strided_slice %39 {offsets = [0, 0], sizes = [8, 16], strides = [1, 1]} : vector<16x32xbf16> to vector<8x16xbf16>
    %cst_36 = arith.constant dense<0.000000e+00> : vector<8x16xf32>
    %60 = tpu.matmul %58, %59, %cst_36 {dimension_numbers = #tpu.dot_dimension_numbers<[1], [0], [0], [1], [0, 0, 1, 1], [], []>} : vector<8x8xbf16>, vector<8x16xbf16>, vector<8x16xf32> -> vector<8x16xf32>
    %61 = arith.truncf %60 : vector<8x16xf32> to vector<8x16xbf16>
    %62 = vector.extract_strided_slice %41 {offsets = [0, 0], sizes = [16, 32], strides = [1, 1]} : vector<32x32xbf16> to vector<16x32xbf16>
    %cst_37 = arith.constant dense<0.000000e+00> : vector<8x32xf32>
    %63 = tpu.matmul %61, %62, %cst_37 {dimension_numbers = #tpu.dot_dimension_numbers<[1], [0], [0], [1], [0, 0, 1, 1], [], []>} : vector<8x16xbf16>, vector<16x32xbf16>, vector<8x32xf32> -> vector<8x32xf32>
    %64 = vector.extract_strided_slice %31 {offsets = [0, 16], sizes = [8, 16], strides = [1, 1]} : vector<16x32xbf16> to vector<8x16xbf16>
    %65 = vector.extract_strided_slice %35 {offsets = [0, 16], sizes = [8, 16], strides = [1, 1]} : vector<16x32xbf16> to vector<8x16xbf16>
    %cst_38 = arith.constant dense<0.000000e+00> : vector<8x8xf32>
    %66 = tpu.matmul %64, %65, %cst_38 {dimension_numbers = #tpu.dot_dimension_numbers<[1], [1], [0], [0], [0, 0, 1, 0], [], []>} : vector<8x16xbf16>, vector<8x16xbf16>, vector<8x8xf32> -> vector<8x8xf32>
    %67 = vector.extract_strided_slice %12 {offsets = [1, 0, 0], sizes = [1, 8, 8], strides = [1, 1, 1]} : vector<2x8x8xf32> to vector<1x8x8xf32>
    %68 = vector.shape_cast %67 : vector<1x8x8xf32> to vector<8x8xf32>
    %69 = arith.addf %66, %68 : vector<8x8xf32>
    %cst_39 = arith.constant dense<0xFF800000> : vector<8xf32>
    %70 = vector.multi_reduction <maximumf>, %69, %cst_39 [1] : vector<8x8xf32> to vector<8xf32>
    %71 = vector.shape_cast %70 : vector<8xf32> to vector<8x1xf32>
    %72 = vector.broadcast %71 : vector<8x1xf32> to vector<8x8xf32>
    %73 = arith.subf %69, %72 : vector<8x8xf32>
    %74 = math.exp %73 : vector<8x8xf32>
    %cst_40 = arith.constant dense<0.000000e+00> : vector<8xf32>
    %75 = vector.multi_reduction <add>, %74, %cst_40 [1] : vector<8x8xf32> to vector<8xf32>
    %76 = vector.shape_cast %75 : vector<8xf32> to vector<8x1xf32>
    %77 = tpu.reciprocal %76 {approx = true} : vector<8x1xf32> -> vector<8x1xf32>
    %78 = vector.broadcast %77 : vector<8x1xf32> to vector<8x8xf32>
    %79 = arith.mulf %74, %78 : vector<8x8xf32>
    %80 = arith.truncf %79 : vector<8x8xf32> to vector<8x8xbf16>
    %81 = vector.extract_strided_slice %39 {offsets = [0, 16], sizes = [8, 16], strides = [1, 1]} : vector<16x32xbf16> to vector<8x16xbf16>
    %cst_41 = arith.constant dense<0.000000e+00> : vector<8x16xf32>
    %82 = tpu.matmul %80, %81, %cst_41 {dimension_numbers = #tpu.dot_dimension_numbers<[1], [0], [0], [1], [0, 0, 1, 1], [], []>} : vector<8x8xbf16>, vector<8x16xbf16>, vector<8x16xf32> -> vector<8x16xf32>
    %83 = arith.truncf %82 : vector<8x16xf32> to vector<8x16xbf16>
    %84 = vector.extract_strided_slice %41 {offsets = [16, 0], sizes = [16, 32], strides = [1, 1]} : vector<32x32xbf16> to vector<16x32xbf16>
    %cst_42 = arith.constant dense<0.000000e+00> : vector<8x32xf32>
    %85 = tpu.matmul %83, %84, %cst_42 {dimension_numbers = #tpu.dot_dimension_numbers<[1], [0], [0], [1], [0, 0, 1, 1], [], []>} : vector<8x16xbf16>, vector<16x32xbf16>, vector<8x32xf32> -> vector<8x32xf32>
    %86 = arith.addf %63, %85 : vector<8x32xf32>
    %87 = vector.extract_strided_slice %31 {offsets = [8, 0], sizes = [8, 16], strides = [1, 1]} : vector<16x32xbf16> to vector<8x16xbf16>
    %88 = vector.extract_strided_slice %35 {offsets = [8, 0], sizes = [8, 16], strides = [1, 1]} : vector<16x32xbf16> to vector<8x16xbf16>
    %cst_43 = arith.constant dense<0.000000e+00> : vector<8x8xf32>
    %89 = tpu.matmul %87, %88, %cst_43 {dimension_numbers = #tpu.dot_dimension_numbers<[1], [1], [0], [0], [0, 0, 1, 0], [], []>} : vector<8x16xbf16>, vector<8x16xbf16>, vector<8x8xf32> -> vector<8x8xf32>
    %90 = vector.extract_strided_slice %12 {offsets = [0, 0, 0], sizes = [1, 8, 8], strides = [1, 1, 1]} : vector<2x8x8xf32> to vector<1x8x8xf32>
    %91 = vector.shape_cast %90 : vector<1x8x8xf32> to vector<8x8xf32>
    %92 = arith.addf %89, %91 : vector<8x8xf32>
    %cst_44 = arith.constant dense<0xFF800000> : vector<8xf32>
    %93 = vector.multi_reduction <maximumf>, %92, %cst_44 [1] : vector<8x8xf32> to vector<8xf32>
    %94 = vector.shape_cast %93 : vector<8xf32> to vector<8x1xf32>
    %95 = vector.broadcast %94 : vector<8x1xf32> to vector<8x8xf32>
    %96 = arith.subf %92, %95 : vector<8x8xf32>
    %97 = math.exp %96 : vector<8x8xf32>
    %cst_45 = arith.constant dense<0.000000e+00> : vector<8xf32>
    %98 = vector.multi_reduction <add>, %97, %cst_45 [1] : vector<8x8xf32> to vector<8xf32>
    %99 = vector.shape_cast %98 : vector<8xf32> to vector<8x1xf32>
    %100 = tpu.reciprocal %99 {approx = true} : vector<8x1xf32> -> vector<8x1xf32>
    %101 = vector.broadcast %100 : vector<8x1xf32> to vector<8x8xf32>
    %102 = arith.mulf %97, %101 : vector<8x8xf32>
    %103 = arith.truncf %102 : vector<8x8xf32> to vector<8x8xbf16>
    %104 = vector.extract_strided_slice %39 {offsets = [8, 0], sizes = [8, 16], strides = [1, 1]} : vector<16x32xbf16> to vector<8x16xbf16>
    %cst_46 = arith.constant dense<0.000000e+00> : vector<8x16xf32>
    %105 = tpu.matmul %103, %104, %cst_46 {dimension_numbers = #tpu.dot_dimension_numbers<[1], [0], [0], [1], [0, 0, 1, 1], [], []>} : vector<8x8xbf16>, vector<8x16xbf16>, vector<8x16xf32> -> vector<8x16xf32>
    %106 = arith.truncf %105 : vector<8x16xf32> to vector<8x16xbf16>
    %107 = vector.extract_strided_slice %41 {offsets = [0, 0], sizes = [16, 32], strides = [1, 1]} : vector<32x32xbf16> to vector<16x32xbf16>
    %cst_47 = arith.constant dense<0.000000e+00> : vector<8x32xf32>
    %108 = tpu.matmul %106, %107, %cst_47 {dimension_numbers = #tpu.dot_dimension_numbers<[1], [0], [0], [1], [0, 0, 1, 1], [], []>} : vector<8x16xbf16>, vector<16x32xbf16>, vector<8x32xf32> -> vector<8x32xf32>
    %109 = vector.extract_strided_slice %31 {offsets = [8, 16], sizes = [8, 16], strides = [1, 1]} : vector<16x32xbf16> to vector<8x16xbf16>
    %110 = vector.extract_strided_slice %35 {offsets = [8, 16], sizes = [8, 16], strides = [1, 1]} : vector<16x32xbf16> to vector<8x16xbf16>
    %cst_48 = arith.constant dense<0.000000e+00> : vector<8x8xf32>
    %111 = tpu.matmul %109, %110, %cst_48 {dimension_numbers = #tpu.dot_dimension_numbers<[1], [1], [0], [0], [0, 0, 1, 0], [], []>} : vector<8x16xbf16>, vector<8x16xbf16>, vector<8x8xf32> -> vector<8x8xf32>
    %112 = vector.extract_strided_slice %12 {offsets = [1, 0, 0], sizes = [1, 8, 8], strides = [1, 1, 1]} : vector<2x8x8xf32> to vector<1x8x8xf32>
    %113 = vector.shape_cast %112 : vector<1x8x8xf32> to vector<8x8xf32>
    %114 = arith.addf %111, %113 : vector<8x8xf32>
    %cst_49 = arith.constant dense<0xFF800000> : vector<8xf32>
    %115 = vector.multi_reduction <maximumf>, %114, %cst_49 [1] : vector<8x8xf32> to vector<8xf32>
    %116 = vector.shape_cast %115 : vector<8xf32> to vector<8x1xf32>
    %117 = vector.broadcast %116 : vector<8x1xf32> to vector<8x8xf32>
    %118 = arith.subf %114, %117 : vector<8x8xf32>
    %119 = math.exp %118 : vector<8x8xf32>
    %cst_50 = arith.constant dense<0.000000e+00> : vector<8xf32>
    %120 = vector.multi_reduction <add>, %119, %cst_50 [1] : vector<8x8xf32> to vector<8xf32>
    %121 = vector.shape_cast %120 : vector<8xf32> to vector<8x1xf32>
    %122 = tpu.reciprocal %121 {approx = true} : vector<8x1xf32> -> vector<8x1xf32>
    %123 = vector.broadcast %122 : vector<8x1xf32> to vector<8x8xf32>
    %124 = arith.mulf %119, %123 : vector<8x8xf32>
    %125 = arith.truncf %124 : vector<8x8xf32> to vector<8x8xbf16>
    %126 = vector.extract_strided_slice %39 {offsets = [8, 16], sizes = [8, 16], strides = [1, 1]} : vector<16x32xbf16> to vector<8x16xbf16>
    %cst_51 = arith.constant dense<0.000000e+00> : vector<8x16xf32>
    %127 = tpu.matmul %125, %126, %cst_51 {dimension_numbers = #tpu.dot_dimension_numbers<[1], [0], [0], [1], [0, 0, 1, 1], [], []>} : vector<8x8xbf16>, vector<8x16xbf16>, vector<8x16xf32> -> vector<8x16xf32>
    %128 = arith.truncf %127 : vector<8x16xf32> to vector<8x16xbf16>
    %129 = vector.extract_strided_slice %41 {offsets = [16, 0], sizes = [16, 32], strides = [1, 1]} : vector<32x32xbf16> to vector<16x32xbf16>
    %cst_52 = arith.constant dense<0.000000e+00> : vector<8x32xf32>
    %130 = tpu.matmul %128, %129, %cst_52 {dimension_numbers = #tpu.dot_dimension_numbers<[1], [0], [0], [1], [0, 0, 1, 1], [], []>} : vector<8x16xbf16>, vector<16x32xbf16>, vector<8x32xf32> -> vector<8x32xf32>
    %131 = arith.addf %108, %130 : vector<8x32xf32>
    %132 = tpu.concatenate %86, %131 in 0 : vector<8x32xf32>, vector<8x32xf32> -> vector<16x32xf32>
    %133 = arith.addf %3, %132 : vector<16x32xf32>
    %c0_53 = arith.constant 0 : index
    %c0_54 = arith.constant 0 : index
    %c0_55 = arith.constant 0 : index
    %134 = vector.load %arg11[%c0_53, %c0_54, %c0_55] : memref<1x1x32xf32, #tpu.memory_space<vmem>>, vector<1x1x32xf32>
    %135 = vector.shape_cast %134 : vector<1x1x32xf32> to vector<1x32xf32>
    %136 = arith.mulf %133, %133 : vector<16x32xf32>
    %cst_56 = arith.constant dense<0.000000e+00> : vector<16xf32>
    %137 = vector.multi_reduction <add>, %136, %cst_56 [1] : vector<16x32xf32> to vector<16xf32>
    %138 = vector.shape_cast %137 : vector<16xf32> to vector<16x1xf32>
    %cst_57 = arith.constant 3.200000e+01 : f32
    %139 = vector.broadcast %cst_57 : f32 to vector<16x1xf32>
    %140 = arith.divf %138, %139 : vector<16x1xf32>
    %cst_58 = arith.constant 9.99999997E-7 : f32
    %141 = vector.broadcast %cst_58 : f32 to vector<16x1xf32>
    %142 = arith.addf %140, %141 : vector<16x1xf32>
    %143 = math.rsqrt %142 : vector<16x1xf32>
    %144 = vector.broadcast %143 : vector<16x1xf32> to vector<16x32xf32>
    %145 = arith.mulf %133, %144 : vector<16x32xf32>
    %146 = vector.broadcast %135 : vector<1x32xf32> to vector<16x32xf32>
    %147 = arith.mulf %146, %145 : vector<16x32xf32>
    %148 = arith.truncf %147 : vector<16x32xf32> to vector<16x32xbf16>
    %c0_59 = arith.constant 0 : index
    %c0_60 = arith.constant 0 : index
    %c0_61 = arith.constant 0 : index
    %149 = vector.load %arg12[%c0_59, %c0_60, %c0_61] : memref<1x32x32xbf16, #tpu.memory_space<vmem>>, vector<1x32x32xbf16>
    %150 = vector.shape_cast %149 : vector<1x32x32xbf16> to vector<32x32xbf16>
    %cst_62 = arith.constant dense<0.000000e+00> : vector<16x32xf32>
    %151 = tpu.matmul %148, %150, %cst_62 {dimension_numbers = #tpu.dot_dimension_numbers<[1], [0], [0], [1], [0, 0, 1, 1], [], []>} : vector<16x32xbf16>, vector<32x32xbf16>, vector<16x32xf32> -> vector<16x32xf32>
    %152 = arith.truncf %151 : vector<16x32xf32> to vector<16x32xbf16>
    %c0_63 = arith.constant 0 : index
    %c0_64 = arith.constant 0 : index
    %c0_65 = arith.constant 0 : index
    %153 = vector.load %arg13[%c0_63, %c0_64, %c0_65] : memref<1x32x32xbf16, #tpu.memory_space<vmem>>, vector<1x32x32xbf16>
    %154 = vector.shape_cast %153 : vector<1x32x32xbf16> to vector<32x32xbf16>
    %cst_66 = arith.constant dense<0.000000e+00> : vector<16x32xf32>
    %155 = tpu.matmul %4, %154, %cst_66 {dimension_numbers = #tpu.dot_dimension_numbers<[1], [0], [0], [1], [0, 0, 1, 1], [], []>} : vector<16x32xbf16>, vector<32x32xbf16>, vector<16x32xf32> -> vector<16x32xf32>
    %156 = arith.truncf %155 : vector<16x32xf32> to vector<16x32xbf16>
    %c0_67 = arith.constant 0 : index
    %c0_68 = arith.constant 0 : index
    %c0_69 = arith.constant 0 : index
    %157 = vector.load %arg14[%c0_67, %c0_68, %c0_69] : memref<1x32x32xbf16, #tpu.memory_space<vmem>>, vector<1x32x32xbf16>
    %158 = vector.shape_cast %157 : vector<1x32x32xbf16> to vector<32x32xbf16>
    %cst_70 = arith.constant dense<0.000000e+00> : vector<16x32xf32>
    %159 = tpu.matmul %4, %158, %cst_70 {dimension_numbers = #tpu.dot_dimension_numbers<[1], [0], [0], [1], [0, 0, 1, 1], [], []>} : vector<16x32xbf16>, vector<32x32xbf16>, vector<16x32xf32> -> vector<16x32xf32>
    %160 = arith.truncf %159 : vector<16x32xf32> to vector<16x32xbf16>
    %c0_71 = arith.constant 0 : index
    %c0_72 = arith.constant 0 : index
    %c0_73 = arith.constant 0 : index
    %161 = vector.load %arg15[%c0_71, %c0_72, %c0_73] : memref<1x32x32xbf16, #tpu.memory_space<vmem>>, vector<1x32x32xbf16>
    %162 = vector.shape_cast %161 : vector<1x32x32xbf16> to vector<32x32xbf16>
    %163 = vector.extract_strided_slice %152 {offsets = [0, 0], sizes = [8, 16], strides = [1, 1]} : vector<16x32xbf16> to vector<8x16xbf16>
    %164 = vector.extract_strided_slice %156 {offsets = [0, 0], sizes = [8, 16], strides = [1, 1]} : vector<16x32xbf16> to vector<8x16xbf16>
    %cst_74 = arith.constant dense<0.000000e+00> : vector<8x8xf32>
    %165 = tpu.matmul %163, %164, %cst_74 {dimension_numbers = #tpu.dot_dimension_numbers<[1], [1], [0], [0], [0, 0, 1, 0], [], []>} : vector<8x16xbf16>, vector<8x16xbf16>, vector<8x8xf32> -> vector<8x8xf32>
    %cst_75 = arith.constant dense<0xFF800000> : vector<8xf32>
    %166 = vector.multi_reduction <maximumf>, %165, %cst_75 [1] : vector<8x8xf32> to vector<8xf32>
    %167 = vector.shape_cast %166 : vector<8xf32> to vector<8x1xf32>
    %168 = vector.broadcast %167 : vector<8x1xf32> to vector<8x8xf32>
    %169 = arith.subf %165, %168 : vector<8x8xf32>
    %170 = math.exp %169 : vector<8x8xf32>
    %cst_76 = arith.constant dense<0.000000e+00> : vector<8xf32>
    %171 = vector.multi_reduction <add>, %170, %cst_76 [1] : vector<8x8xf32> to vector<8xf32>
    %172 = vector.shape_cast %171 : vector<8xf32> to vector<8x1xf32>
    %173 = tpu.reciprocal %172 {approx = true} : vector<8x1xf32> -> vector<8x1xf32>
    %174 = vector.broadcast %173 : vector<8x1xf32> to vector<8x8xf32>
    %175 = arith.mulf %170, %174 : vector<8x8xf32>
    %176 = arith.truncf %175 : vector<8x8xf32> to vector<8x8xbf16>
    %177 = vector.extract_strided_slice %160 {offsets = [0, 0], sizes = [8, 16], strides = [1, 1]} : vector<16x32xbf16> to vector<8x16xbf16>
    %cst_77 = arith.constant dense<0.000000e+00> : vector<8x16xf32>
    %178 = tpu.matmul %176, %177, %cst_77 {dimension_numbers = #tpu.dot_dimension_numbers<[1], [0], [0], [1], [0, 0, 1, 1], [], []>} : vector<8x8xbf16>, vector<8x16xbf16>, vector<8x16xf32> -> vector<8x16xf32>
    %179 = arith.truncf %178 : vector<8x16xf32> to vector<8x16xbf16>
    %180 = vector.extract_strided_slice %162 {offsets = [0, 0], sizes = [16, 32], strides = [1, 1]} : vector<32x32xbf16> to vector<16x32xbf16>
    %cst_78 = arith.constant dense<0.000000e+00> : vector<8x32xf32>
    %181 = tpu.matmul %179, %180, %cst_78 {dimension_numbers = #tpu.dot_dimension_numbers<[1], [0], [0], [1], [0, 0, 1, 1], [], []>} : vector<8x16xbf16>, vector<16x32xbf16>, vector<8x32xf32> -> vector<8x32xf32>
    %182 = vector.extract_strided_slice %152 {offsets = [0, 16], sizes = [8, 16], strides = [1, 1]} : vector<16x32xbf16> to vector<8x16xbf16>
    %183 = vector.extract_strided_slice %156 {offsets = [0, 16], sizes = [8, 16], strides = [1, 1]} : vector<16x32xbf16> to vector<8x16xbf16>
    %cst_79 = arith.constant dense<0.000000e+00> : vector<8x8xf32>
    %184 = tpu.matmul %182, %183, %cst_79 {dimension_numbers = #tpu.dot_dimension_numbers<[1], [1], [0], [0], [0, 0, 1, 0], [], []>} : vector<8x16xbf16>, vector<8x16xbf16>, vector<8x8xf32> -> vector<8x8xf32>
    %cst_80 = arith.constant dense<0xFF800000> : vector<8xf32>
    %185 = vector.multi_reduction <maximumf>, %184, %cst_80 [1] : vector<8x8xf32> to vector<8xf32>
    %186 = vector.shape_cast %185 : vector<8xf32> to vector<8x1xf32>
    %187 = vector.broadcast %186 : vector<8x1xf32> to vector<8x8xf32>
    %188 = arith.subf %184, %187 : vector<8x8xf32>
    %189 = math.exp %188 : vector<8x8xf32>
    %cst_81 = arith.constant dense<0.000000e+00> : vector<8xf32>
    %190 = vector.multi_reduction <add>, %189, %cst_81 [1] : vector<8x8xf32> to vector<8xf32>
    %191 = vector.shape_cast %190 : vector<8xf32> to vector<8x1xf32>
    %192 = tpu.reciprocal %191 {approx = true} : vector<8x1xf32> -> vector<8x1xf32>
    %193 = vector.broadcast %192 : vector<8x1xf32> to vector<8x8xf32>
    %194 = arith.mulf %189, %193 : vector<8x8xf32>
    %195 = arith.truncf %194 : vector<8x8xf32> to vector<8x8xbf16>
    %196 = vector.extract_strided_slice %160 {offsets = [0, 16], sizes = [8, 16], strides = [1, 1]} : vector<16x32xbf16> to vector<8x16xbf16>
    %cst_82 = arith.constant dense<0.000000e+00> : vector<8x16xf32>
    %197 = tpu.matmul %195, %196, %cst_82 {dimension_numbers = #tpu.dot_dimension_numbers<[1], [0], [0], [1], [0, 0, 1, 1], [], []>} : vector<8x8xbf16>, vector<8x16xbf16>, vector<8x16xf32> -> vector<8x16xf32>
    %198 = arith.truncf %197 : vector<8x16xf32> to vector<8x16xbf16>
    %199 = vector.extract_strided_slice %162 {offsets = [16, 0], sizes = [16, 32], strides = [1, 1]} : vector<32x32xbf16> to vector<16x32xbf16>
    %cst_83 = arith.constant dense<0.000000e+00> : vector<8x32xf32>
    %200 = tpu.matmul %198, %199, %cst_83 {dimension_numbers = #tpu.dot_dimension_numbers<[1], [0], [0], [1], [0, 0, 1, 1], [], []>} : vector<8x16xbf16>, vector<16x32xbf16>, vector<8x32xf32> -> vector<8x32xf32>
    %201 = arith.addf %181, %200 : vector<8x32xf32>
    %202 = vector.extract_strided_slice %152 {offsets = [8, 0], sizes = [8, 16], strides = [1, 1]} : vector<16x32xbf16> to vector<8x16xbf16>
    %203 = vector.extract_strided_slice %156 {offsets = [8, 0], sizes = [8, 16], strides = [1, 1]} : vector<16x32xbf16> to vector<8x16xbf16>
    %cst_84 = arith.constant dense<0.000000e+00> : vector<8x8xf32>
    %204 = tpu.matmul %202, %203, %cst_84 {dimension_numbers = #tpu.dot_dimension_numbers<[1], [1], [0], [0], [0, 0, 1, 0], [], []>} : vector<8x16xbf16>, vector<8x16xbf16>, vector<8x8xf32> -> vector<8x8xf32>
    %cst_85 = arith.constant dense<0xFF800000> : vector<8xf32>
    %205 = vector.multi_reduction <maximumf>, %204, %cst_85 [1] : vector<8x8xf32> to vector<8xf32>
    %206 = vector.shape_cast %205 : vector<8xf32> to vector<8x1xf32>
    %207 = vector.broadcast %206 : vector<8x1xf32> to vector<8x8xf32>
    %208 = arith.subf %204, %207 : vector<8x8xf32>
    %209 = math.exp %208 : vector<8x8xf32>
    %cst_86 = arith.constant dense<0.000000e+00> : vector<8xf32>
    %210 = vector.multi_reduction <add>, %209, %cst_86 [1] : vector<8x8xf32> to vector<8xf32>
    %211 = vector.shape_cast %210 : vector<8xf32> to vector<8x1xf32>
    %212 = tpu.reciprocal %211 {approx = true} : vector<8x1xf32> -> vector<8x1xf32>
    %213 = vector.broadcast %212 : vector<8x1xf32> to vector<8x8xf32>
    %214 = arith.mulf %209, %213 : vector<8x8xf32>
    %215 = arith.truncf %214 : vector<8x8xf32> to vector<8x8xbf16>
    %216 = vector.extract_strided_slice %160 {offsets = [8, 0], sizes = [8, 16], strides = [1, 1]} : vector<16x32xbf16> to vector<8x16xbf16>
    %cst_87 = arith.constant dense<0.000000e+00> : vector<8x16xf32>
    %217 = tpu.matmul %215, %216, %cst_87 {dimension_numbers = #tpu.dot_dimension_numbers<[1], [0], [0], [1], [0, 0, 1, 1], [], []>} : vector<8x8xbf16>, vector<8x16xbf16>, vector<8x16xf32> -> vector<8x16xf32>
    %218 = arith.truncf %217 : vector<8x16xf32> to vector<8x16xbf16>
    %219 = vector.extract_strided_slice %162 {offsets = [0, 0], sizes = [16, 32], strides = [1, 1]} : vector<32x32xbf16> to vector<16x32xbf16>
    %cst_88 = arith.constant dense<0.000000e+00> : vector<8x32xf32>
    %220 = tpu.matmul %218, %219, %cst_88 {dimension_numbers = #tpu.dot_dimension_numbers<[1], [0], [0], [1], [0, 0, 1, 1], [], []>} : vector<8x16xbf16>, vector<16x32xbf16>, vector<8x32xf32> -> vector<8x32xf32>
    %221 = vector.extract_strided_slice %152 {offsets = [8, 16], sizes = [8, 16], strides = [1, 1]} : vector<16x32xbf16> to vector<8x16xbf16>
    %222 = vector.extract_strided_slice %156 {offsets = [8, 16], sizes = [8, 16], strides = [1, 1]} : vector<16x32xbf16> to vector<8x16xbf16>
    %cst_89 = arith.constant dense<0.000000e+00> : vector<8x8xf32>
    %223 = tpu.matmul %221, %222, %cst_89 {dimension_numbers = #tpu.dot_dimension_numbers<[1], [1], [0], [0], [0, 0, 1, 0], [], []>} : vector<8x16xbf16>, vector<8x16xbf16>, vector<8x8xf32> -> vector<8x8xf32>
    %cst_90 = arith.constant dense<0xFF800000> : vector<8xf32>
    %224 = vector.multi_reduction <maximumf>, %223, %cst_90 [1] : vector<8x8xf32> to vector<8xf32>
    %225 = vector.shape_cast %224 : vector<8xf32> to vector<8x1xf32>
    %226 = vector.broadcast %225 : vector<8x1xf32> to vector<8x8xf32>
    %227 = arith.subf %223, %226 : vector<8x8xf32>
    %228 = math.exp %227 : vector<8x8xf32>
    %cst_91 = arith.constant dense<0.000000e+00> : vector<8xf32>
    %229 = vector.multi_reduction <add>, %228, %cst_91 [1] : vector<8x8xf32> to vector<8xf32>
    %230 = vector.shape_cast %229 : vector<8xf32> to vector<8x1xf32>
    %231 = tpu.reciprocal %230 {approx = true} : vector<8x1xf32> -> vector<8x1xf32>
    %232 = vector.broadcast %231 : vector<8x1xf32> to vector<8x8xf32>
    %233 = arith.mulf %228, %232 : vector<8x8xf32>
    %234 = arith.truncf %233 : vector<8x8xf32> to vector<8x8xbf16>
    %235 = vector.extract_strided_slice %160 {offsets = [8, 16], sizes = [8, 16], strides = [1, 1]} : vector<16x32xbf16> to vector<8x16xbf16>
    %cst_92 = arith.constant dense<0.000000e+00> : vector<8x16xf32>
    %236 = tpu.matmul %234, %235, %cst_92 {dimension_numbers = #tpu.dot_dimension_numbers<[1], [0], [0], [1], [0, 0, 1, 1], [], []>} : vector<8x8xbf16>, vector<8x16xbf16>, vector<8x16xf32> -> vector<8x16xf32>
    %237 = arith.truncf %236 : vector<8x16xf32> to vector<8x16xbf16>
    %238 = vector.extract_strided_slice %162 {offsets = [16, 0], sizes = [16, 32], strides = [1, 1]} : vector<32x32xbf16> to vector<16x32xbf16>
    %cst_93 = arith.constant dense<0.000000e+00> : vector<8x32xf32>
    %239 = tpu.matmul %237, %238, %cst_93 {dimension_numbers = #tpu.dot_dimension_numbers<[1], [0], [0], [1], [0, 0, 1, 1], [], []>} : vector<8x16xbf16>, vector<16x32xbf16>, vector<8x32xf32> -> vector<8x32xf32>
    %240 = arith.addf %220, %239 : vector<8x32xf32>
    %241 = tpu.concatenate %201, %240 in 0 : vector<8x32xf32>, vector<8x32xf32> -> vector<16x32xf32>
    %242 = arith.addf %133, %241 : vector<16x32xf32>
    %c0_94 = arith.constant 0 : index
    %c0_95 = arith.constant 0 : index
    %c0_96 = arith.constant 0 : index
    %243 = vector.load %arg16[%c0_94, %c0_95, %c0_96] : memref<1x1x32xf32, #tpu.memory_space<vmem>>, vector<1x1x32xf32>
    %244 = vector.shape_cast %243 : vector<1x1x32xf32> to vector<1x32xf32>
    %245 = arith.mulf %242, %242 : vector<16x32xf32>
    %cst_97 = arith.constant dense<0.000000e+00> : vector<16xf32>
    %246 = vector.multi_reduction <add>, %245, %cst_97 [1] : vector<16x32xf32> to vector<16xf32>
    %247 = vector.shape_cast %246 : vector<16xf32> to vector<16x1xf32>
    %cst_98 = arith.constant 3.200000e+01 : f32
    %248 = vector.broadcast %cst_98 : f32 to vector<16x1xf32>
    %249 = arith.divf %247, %248 : vector<16x1xf32>
    %cst_99 = arith.constant 9.99999997E-7 : f32
    %250 = vector.broadcast %cst_99 : f32 to vector<16x1xf32>
    %251 = arith.addf %249, %250 : vector<16x1xf32>
    %252 = math.rsqrt %251 : vector<16x1xf32>
    %253 = vector.broadcast %252 : vector<16x1xf32> to vector<16x32xf32>
    %254 = arith.mulf %242, %253 : vector<16x32xf32>
    %255 = vector.broadcast %244 : vector<1x32xf32> to vector<16x32xf32>
    %256 = arith.mulf %255, %254 : vector<16x32xf32>
    %257 = arith.truncf %256 : vector<16x32xf32> to vector<16x32xbf16>
    %c0_100 = arith.constant 0 : index
    %c0_101 = arith.constant 0 : index
    %c0_102 = arith.constant 0 : index
    %258 = vector.load %arg17[%c0_100, %c0_101, %c0_102] : memref<1x32x128xbf16, #tpu.memory_space<vmem>>, vector<1x32x128xbf16>
    %259 = vector.shape_cast %258 : vector<1x32x128xbf16> to vector<32x128xbf16>
    %cst_103 = arith.constant dense<0.000000e+00> : vector<16x128xf32>
    %260 = tpu.matmul %257, %259, %cst_103 {dimension_numbers = #tpu.dot_dimension_numbers<[1], [0], [0], [1], [0, 0, 1, 1], [], []>} : vector<16x32xbf16>, vector<32x128xbf16>, vector<16x128xf32> -> vector<16x128xf32>
    %cst_104 = arith.constant 0.000000e+00 : f32
    %261 = vector.broadcast %cst_104 : f32 to vector<16x128xf32>
    %262 = arith.maximumf %260, %261 : vector<16x128xf32>
    %c0_105 = arith.constant 0 : index
    %c0_106 = arith.constant 0 : index
    %c0_107 = arith.constant 0 : index
    %263 = vector.load %arg18[%c0_105, %c0_106, %c0_107] : memref<1x32x128xbf16, #tpu.memory_space<vmem>>, vector<1x32x128xbf16>
    %264 = vector.shape_cast %263 : vector<1x32x128xbf16> to vector<32x128xbf16>
    %cst_108 = arith.constant dense<0.000000e+00> : vector<16x128xf32>
    %265 = tpu.matmul %257, %264, %cst_108 {dimension_numbers = #tpu.dot_dimension_numbers<[1], [0], [0], [1], [0, 0, 1, 1], [], []>} : vector<16x32xbf16>, vector<32x128xbf16>, vector<16x128xf32> -> vector<16x128xf32>
    %266 = arith.mulf %262, %265 : vector<16x128xf32>
    %267 = arith.truncf %266 : vector<16x128xf32> to vector<16x128xbf16>
    %c0_109 = arith.constant 0 : index
    %c0_110 = arith.constant 0 : index
    %c0_111 = arith.constant 0 : index
    %268 = vector.load %arg19[%c0_109, %c0_110, %c0_111] : memref<1x128x32xbf16, #tpu.memory_space<vmem>>, vector<1x128x32xbf16>
    %269 = vector.shape_cast %268 : vector<1x128x32xbf16> to vector<128x32xbf16>
    %cst_112 = arith.constant dense<0.000000e+00> : vector<16x32xf32>
    %270 = tpu.matmul %267, %269, %cst_112 {dimension_numbers = #tpu.dot_dimension_numbers<[1], [0], [0], [1], [0, 0, 1, 1], [], []>} : vector<16x128xbf16>, vector<128x32xbf16>, vector<16x32xf32> -> vector<16x32xf32>
    %271 = arith.addf %242, %270 : vector<16x32xf32>
    %c0_113 = arith.constant 0 : index
    %c0_114 = arith.constant 0 : index
    %272 = vector.load %arg21[%c0_113, %c0_114] : memref<16x32xf32, #tpu.memory_space<vmem>>, vector<16x32xf32>
    tpu.vector_store %arg21[%c0_113, %c0_114], %271 {strides = array<i32>} : memref<16x32xf32, #tpu.memory_space<vmem>>, vector<16x32xf32>,
    %c1_i32 = arith.constant 1 : i32
    %273 = arith.cmpi eq, %arg0, %c1_i32 : i32
    %274 = arith.extui %273 : i1 to i32
    %c0_i32_115 = arith.constant 0 : i32
    %275 = arith.cmpi ne, %274, %c0_i32_115 : i32
    scf.if %275 {
      %c0_116 = arith.constant 0 : index
      %c0_117 = arith.constant 0 : index
      %276 = vector.load %arg5[%c0_116, %c0_117] : memref<1x32xf32, #tpu.memory_space<vmem>>, vector<1x32xf32>
      %277 = arith.mulf %271, %271 : vector<16x32xf32>
      %cst_118 = arith.constant dense<0.000000e+00> : vector<16xf32>
      %278 = vector.multi_reduction <add>, %277, %cst_118 [1] : vector<16x32xf32> to vector<16xf32>
      %279 = vector.shape_cast %278 : vector<16xf32> to vector<16x1xf32>
      %cst_119 = arith.constant 3.200000e+01 : f32
      %280 = vector.broadcast %cst_119 : f32 to vector<16x1xf32>
      %281 = arith.divf %279, %280 : vector<16x1xf32>
      %cst_120 = arith.constant 9.99999997E-7 : f32
      %282 = vector.broadcast %cst_120 : f32 to vector<16x1xf32>
      %283 = arith.addf %281, %282 : vector<16x1xf32>
      %284 = math.rsqrt %283 : vector<16x1xf32>
      %285 = vector.broadcast %284 : vector<16x1xf32> to vector<16x32xf32>
      %286 = arith.mulf %271, %285 : vector<16x32xf32>
      %287 = vector.broadcast %276 : vector<1x32xf32> to vector<16x32xf32>
      %288 = arith.mulf %287, %286 : vector<16x32xf32>
      %c0_121 = arith.constant 0 : index
      %c0_122 = arith.constant 0 : index
      %289 = vector.load %arg20[%c0_121, %c0_122] : memref<16x32xf32, #tpu.memory_space<vmem>>, vector<16x32xf32>
      tpu.vector_store %arg20[%c0_121, %c0_122], %288 {strides = array<i32>} : memref<16x32xf32, #tpu.memory_space<vmem>>, vector<16x32xf32>,
    } else {
    }
    return
  }
  func.func @transform_0(%arg0: i32) -> (i32, i32) {
    %c0_i32 = arith.constant 0 : i32
    %c0_i32_0 = arith.constant 0 : i32
    %c0_i32_1 = arith.constant 0 : i32
    return %c0_i32, %c0_i32_0 : i32, i32
  }
  func.func @transform_1(%arg0: i32) -> (i32, i32) {
    %c0_i32 = arith.constant 0 : i32
    %c0_i32_0 = arith.constant 0 : i32
    %c0_i32_1 = arith.constant 0 : i32
    return %c0_i32, %c0_i32_0 : i32, i32
  }
  func.func @transform_2(%arg0: i32) -> (i32, i32, i32) {
    %c0_i32 = arith.constant 0 : i32
    %c0_i32_0 = arith.constant 0 : i32
    %c0_i32_1 = arith.constant 0 : i32
    %c0_i32_2 = arith.constant 0 : i32
    return %c0_i32, %c0_i32_0, %c0_i32_1 : i32, i32, i32
  }
  func.func @transform_3(%arg0: i32) -> (i32, i32, i32) {
    %c0_i32 = arith.constant 0 : i32
    %c0_i32_0 = arith.constant 0 : i32
    %c0_i32_1 = arith.constant 0 : i32
    %c0_i32_2 = arith.constant 0 : i32
    return %c0_i32, %c0_i32_0, %c0_i32_1 : i32, i32, i32
  }
  func.func @transform_4(%arg0: i32) -> (i32, i32) {
    %c0_i32 = arith.constant 0 : i32
    %c0_i32_0 = arith.constant 0 : i32
    %c0_i32_1 = arith.constant 0 : i32
    return %c0_i32, %c0_i32_0 : i32, i32
  }
  func.func @transform_5(%arg0: i32) -> (i32, i32, i32) {
    %c0_i32 = arith.constant 0 : i32
    %c0_i32_0 = arith.constant 0 : i32
    %c0_i32_1 = arith.constant 0 : i32
    return %arg0, %c0_i32, %c0_i32_0 : i32, i32, i32
  }
  func.func @transform_6(%arg0: i32) -> (i32, i32, i32) {
    %c0_i32 = arith.constant 0 : i32
    %c0_i32_0 = arith.constant 0 : i32
    %c0_i32_1 = arith.constant 0 : i32
    return %arg0, %c0_i32, %c0_i32_0 : i32, i32, i32
  }
  func.func @transform_7(%arg0: i32) -> (i32, i32, i32) {
    %c0_i32 = arith.constant 0 : i32
    %c0_i32_0 = arith.constant 0 : i32
    %c0_i32_1 = arith.constant 0 : i32
    return %arg0, %c0_i32, %c0_i32_0 : i32, i32, i32
  }
  func.func @transform_8(%arg0: i32) -> (i32, i32, i32) {
    %c0_i32 = arith.constant 0 : i32
    %c0_i32_0 = arith.constant 0 : i32
    %c0_i32_1 = arith.constant 0 : i32
    return %arg0, %c0_i32, %c0_i32_0 : i32, i32, i32
  }
  func.func @transform_9(%arg0: i32) -> (i32, i32, i32) {
    %c0_i32 = arith.constant 0 : i32
    %c0_i32_0 = arith.constant 0 : i32
    %c0_i32_1 = arith.constant 0 : i32
    return %arg0, %c0_i32, %c0_i32_0 : i32, i32, i32
  }
  func.func @transform_10(%arg0: i32) -> (i32, i32, i32) {
    %c0_i32 = arith.constant 0 : i32
    %c0_i32_0 = arith.constant 0 : i32
    %c0_i32_1 = arith.constant 0 : i32
    return %arg0, %c0_i32, %c0_i32_0 : i32, i32, i32
  }
  func.func @transform_11(%arg0: i32) -> (i32, i32, i32) {
    %c0_i32 = arith.constant 0 : i32
    %c0_i32_0 = arith.constant 0 : i32
    %c0_i32_1 = arith.constant 0 : i32
    return %arg0, %c0_i32, %c0_i32_0 : i32, i32, i32
  }
  func.func @transform_12(%arg0: i32) -> (i32, i32, i32) {
    %c0_i32 = arith.constant 0 : i32
    %c0_i32_0 = arith.constant 0 : i32
    %c0_i32_1 = arith.constant 0 : i32
    return %arg0, %c0_i32, %c0_i32_0 : i32, i32, i32
  }
  func.func @transform_13(%arg0: i32) -> (i32, i32, i32) {
    %c0_i32 = arith.constant 0 : i32
    %c0_i32_0 = arith.constant 0 : i32
    %c0_i32_1 = arith.constant 0 : i32
    return %arg0, %c0_i32, %c0_i32_0 : i32, i32, i32
  }
  func.func @transform_14(%arg0: i32) -> (i32, i32, i32) {
    %c0_i32 = arith.constant 0 : i32
    %c0_i32_0 = arith.constant 0 : i32
    %c0_i32_1 = arith.constant 0 : i32
    return %arg0, %c0_i32, %c0_i32_0 : i32, i32, i32
  }
  func.func @transform_15(%arg0: i32) -> (i32, i32, i32) {
    %c0_i32 = arith.constant 0 : i32
    %c0_i32_0 = arith.constant 0 : i32
    %c0_i32_1 = arith.constant 0 : i32
    return %arg0, %c0_i32, %c0_i32_0 : i32, i32, i32
  }
  func.func @transform_16(%arg0: i32) -> (i32, i32, i32) {
    %c0_i32 = arith.constant 0 : i32
    %c0_i32_0 = arith.constant 0 : i32
    %c0_i32_1 = arith.constant 0 : i32
    return %arg0, %c0_i32, %c0_i32_0 : i32, i32, i32
  }
  func.func @transform_17(%arg0: i32) -> (i32, i32, i32) {
    %c0_i32 = arith.constant 0 : i32
    %c0_i32_0 = arith.constant 0 : i32
    %c0_i32_1 = arith.constant 0 : i32
    return %arg0, %c0_i32, %c0_i32_0 : i32, i32, i32
  }
  func.func @transform_18(%arg0: i32) -> (i32, i32, i32) {
    %c0_i32 = arith.constant 0 : i32
    %c0_i32_0 = arith.constant 0 : i32
    %c0_i32_1 = arith.constant 0 : i32
    return %arg0, %c0_i32, %c0_i32_0 : i32, i32, i32
  }
  func.func @transform_19(%arg0: i32) -> (i32, i32) {
    %c0_i32 = arith.constant 0 : i32
    %c0_i32_0 = arith.constant 0 : i32
    %c0_i32_1 = arith.constant 0 : i32
    return %c0_i32, %c0_i32_0 : i32, i32
  }
}

</mosaic_0001>

<bundles_post_ra>
// kernel: t5_decoder_forward.1
= control target key start
LH: loop header
LB: loop body
LE: loop exit
PB: predicated region body
PF: predicated region fallthrough
CT: control target
= control target key end

     0   :  { %s4144_s0 = inlined_call_operand.vmem [shape: f32[16,32], index: 0, kind: input, shape index: {}]   ;;  %s4145_s1 = inlined_call_operand.vmem [shape: bf16[16,32], index: 1, kind: input, shape index: {}]   ;;  %s4146_s2 = inlined_call_operand.vmem [shape: f32[2,8,8], index: 2, kind: input, shape index: {}]   ;;  %s4147_s3 = inlined_call_operand.vmem [shape: f32[1,8,8], index: 3, kind: input, shape index: {}]   ;;  %s4148_s4 = inlined_call_operand.vmem [shape: f32[1,32], index: 4, kind: input, shape index: {}]   ;;  %s4149_s5 = inlined_call_operand.vmem [shape: f32[2,1,32], index: 5, kind: input, shape index: {}]   ;;  %s4150_s6 = inlined_call_operand.vmem [shape: bf16[2,32,32], index: 6, kind: input, shape index: {}]   ;;  %s4151_s7 = inlined_call_operand.vmem [shape: bf16[2,32,32], index: 7, kind: input, shape index: {}]   ;;  %s4152_s8 = inlined_call_operand.vmem [shape: bf16[2,32,32], index: 8, kind: input, shape index: {}]   ;;  %s4153_s9 = inlined_call_operand.vmem [shape: bf16[2,32,32], index: 9, kind: input, shape index: {}]   ;;  %s4154_s10 = inlined_call_operand.vmem [shape: f32[2,1,32], index: 10, kind: input, shape index: {}]   ;;  %s4155_s11 = inlined_call_operand.vmem [shape: bf16[2,32,32], index: 11, kind: input, shape index: {}]   ;;  %s4156_s12 = inlined_call_operand.vmem [shape: bf16[2,32,32], index: 12, kind: input, shape index: {}]   ;;  %s4157_s13 = inlined_call_operand.vmem [shape: bf16[2,32,32], index: 13, kind: input, shape index: {}]   ;;  %s4158_s14 = inlined_call_operand.vmem [shape: bf16[2,32,32], index: 14, kind: input, shape index: {}]   ;;  %s4159_s15 = inlined_call_operand.vmem [shape: f32[2,1,32], index: 15, kind: input, shape index: {}]   ;;  %s4160_s16 = inlined_call_operand.vmem [shape: bf16[2,32,128], index: 16, kind: input, shape index: {}]   ;;  %s4161_s17 = inlined_call_operand.vmem [shape: bf16[2,32,128], index: 17, kind: input, shape index: {}]   ;;  %s4162_s18 = inlined_call_operand.vmem [shape: bf16[2,128,32], index: 18, kind: input, shape index: {}]   ;;  %s4163_s19 = inlined_call_operand.hbm [shape: f32[16,32], index: 19, kind: output, shape index: {}]  }
   0x1   :  { %4169 = sst [smem:[#allocation8_spill]] %s4144_s0 }
   0x2   :  { %4170 = sst [smem:[#allocation9_spill]] %s4145_s1 }
   0x3   :  { %4171 = sst [smem:[#allocation10_spill]] %s4146_s2 }
   0x4   :  { %4172 = sst [smem:[#allocation11_spill]] %s4147_s3 }
   0x5   :  { %4173 = sst [smem:[#allocation12_spill]] %s4148_s4 }
   0x6   :  { %4174 = sst [smem:[#allocation13_spill]] %s4150_s6 }
   0x7   :  { %4175 = sst [smem:[#allocation14_spill]] %s4151_s7 }
   0x8   :  { %4176 = sst [smem:[#allocation15_spill]] %s4152_s8 }
   0x9   :  { %4177 = sst [smem:[#allocation16_spill]] %s4153_s9 }
   0xa   :  { %4178 = sst [smem:[#allocation17_spill]] %s4155_s11 }
   0xb   :  { %4179 = sst [smem:[#allocation18_spill]] %s4156_s12 }
   0xc   :  { %4180 = sst [smem:[#allocation19_spill]] %s4157_s13 }
   0xd   :  { %4181 = sst [smem:[#allocation20_spill]] %s4163_s19 }
   0xe   :  { %24 = vsyncpa [#allocation4], 0  ;;  %s3670_s0 = smov 0  }
   0xf LB: > { %4182 = sst [smem:[#allocation6_spill]] %s3562_s0  ;;  %s3676_s30 = sadd.s32 4294967295, %s3562_s0   ;;  %s3562_s0 = sphi %s3670_s0, %s30_s0  }
  0x10   : > { %p3015_p0 = scmp.ge.s32.totalorder %s3562_s0, 1  ;;  %p657_p1 = scmp.lt.s32.totalorder %s3562_s0, 3 }
  0x12   : > { %p658_p2 = pnand %p3015_p0, %p657_p1 }
  0x14   : > { %661 = sbr.rel (%p658_p2) target bundleno = 5307 (0x14bb), region = 96 }
  0x1b   : > { %p767_p3 = scmp.lt.s32.totalorder %s3676_s30, 1  ;;  %p832_p4 = scmp.eq.s32.totalorder %s3676_s30, 0 }
  0x1c   : > { %s4183_s6 = sld [smem:[#allocation13_spill]]  ;;  %s4184_s7 = sld [smem:[#allocation14_spill]] }
  0x1d   : > { %s3683_s20 = scalar_select %p767_p3, %s3676_s30, 1 }
  0x1e   : > { %s4185_s8 = sld [smem:[#allocation15_spill]]  ;;  %s4186_s9 = sld [smem:[#allocation16_spill]] }
  0x1f   : > { %s3109_s2 = sshll.u32 %s3683_s20, 4  ;;  %s4187_s11 = sld [smem:[#allocation17_spill]] }
  0x20   : > { %s4188_s12 = sld [smem:[#allocation18_spill]]  ;;  %s4189_s13 = sld [smem:[#allocation19_spill]] }
  0x21   : > { %s3732_s4 = scalar_lea.vmem %s4158_s14, %s3109_s2  ;;  %s3119_s29 = sshll.u32 %s3683_s20, 6 }
  0x22   : > { %s3693_s25 = scalar_lea.vmem %s4183_s6, %s3109_s2  ;;  %s3698_s27 = scalar_lea.vmem %s4184_s7, %s3109_s2 }
  0x23   : > { %s815_s6 = scalar_lea.vmem %s4159_s15, %s3683_s20  ;;  %s3741_s7 = scalar_lea.vmem %s4160_s16, %s3109_s2 }
  0x24   : > { %s3703_s21 = scalar_lea.vmem %s4185_s8, %s3109_s2  ;;  %s3708_s22 = scalar_lea.vmem %s4186_s9, %s3109_s2 }
  0x25   : > { %s3717_s3 = scalar_lea.vmem %s4187_s11, %s3109_s2  ;;  %s3746_s8 = scalar_lea.vmem %s4161_s17, %s3109_s2 }
  0x26   : > { %s3722_s28 = scalar_lea.vmem %s4188_s12, %s3109_s2  ;;  %s3727_s0 = scalar_lea.vmem %s4189_s13, %s3109_s2 }
  0x27   : > { %4190 = sst [smem:[#allocation7_spill]] %s3727_s0  ;;  %s3752_s9 = scalar_lea.vmem %s4162_s18, %s3119_s29 }
  0x28   : > { %p3038_p5 = scmp.ne.s32.totalorder %s3676_s30, 0 }
  0x29   : > { %s4191_s19 = sld [smem:[#allocation8_spill]] (!%p3038_p5)  ;;  %vm838_vm0 = vcmask (!%p3038_p5), 261120  }
  0x2a   : > { %835 = sbr.rel (%p3038_p5) target bundleno = 49 (0x31), region = 100 }
  0x2f   : > { %v836_v0 = vld [vmem:[%s4191_s19] sm:$0xff] (!%p3038_p5)  ;;  %v837_v1 = vld [vmem:[%s4191_s19 + $0x8] sm:$0xff] (!%p3038_p5) }
  0x30   : > { %839 = vst.msk [vmem:[#allocation2] sm:$0xff] (!%p3038_p5), %vm838_vm0, %v836_v0  ;;  %840 = vst.msk [vmem:[#allocation2 + $0x8] sm:$0xff] (!%p3038_p5), %vm838_vm0, %v837_v1 }
  0x31 PF: > { %vm857_vm1 = vcmask 261120   ;;  %v3449_v8 = vld [vmem:[%s3693_s25] sm:$0xff]   ;;  %v3564_v9 = vmov 0.0   ;;  %vm3565_vm2 = vmmov 0   ;;  %v3450_v10 = vld [vmem:[%s3693_s25 + $0x8] sm:$0xff]   ;;  %s4192_s2 = scalar_lea.vmem %s4149_s5, %s3683_s20  ;;  %vm1063_vm3 = vcmask 130048  }
  0x32   : > { %3201 = vmatprep.subr.bf16.mxu1 %v3564_v9  ;;  %3205 = vmatprep.mubr.msk.bf16.mxu1 %vm3565_vm2, %v3564_v9  ;;  %v3039_v20 = vld [vmem:[%s4192_s2] ss:$0 sm:$0xff]  ;;  %v3452_v26 = vld [vmem:[%s3698_s27 + $0x8] sm:$0xff]   ;;  %s3566_s25 = smov 112   ;;  %vm1126_vm4 = vcmask 1043456   ;;  %s4193_s26 = sld [smem:[#allocation10_spill]] }
  0x33   : > { %3202 = vmatpush3.bf16.msra.mxu1 %v3449_v8  ;;  %3231 = vmatprep.subr.bf16.mxu0 %v3564_v9  ;;  %v3451_v24 = vld [vmem:[%s3698_s27] sm:$0xff]   ;;  %v3454_v28 = vld [vmem:[%s3703_s21 + $0x8] sm:$0xff]   ;;  %s845_s27 = scalar_select %p832_p4, 1.0, 0.0  ;;  %vm1110_vm5 = vcmask 64512  }
  0x34   : > { %3203 = vmatprep.subr.bf16.mxu1 %v3564_v9  ;;  %3233 = vmatprep.mubr.msk.bf16.mxu0 %vm3565_vm2, %v3564_v9  ;;  %v3453_v27 = vld [vmem:[%s3703_s21] sm:$0xff]   ;;  %s4194_s1 = sld [smem:[#allocation11_spill]]  ;;  %s4195_s13 = sld [smem:[#allocation9_spill]] }
  0x35   : > { %v849_v50 = vstv %s845_s27  ;;  %s4197_s27 = sld [smem:[#allocation7_spill]]  ;;  %p3103_p6 = scmp.ne.s32.totalorder %s3676_s30, 1 }
  0x37   : > { %v3761_v2 = vld [vmem:[#allocation2] sm:$0xff]  ;;  %v3763_v3 = vld [vmem:[#allocation2 + $0x8] sm:$0xff]  ;;  %3204 = vmatpush3.bf16.msra.mxu1 %v3450_v10 }
  0x38   : > { %v855_v4 = vmul.f32 %v3761_v2, %v3761_v2  ;;  %v856_v5 = vmul.f32 %v3763_v3, %v3763_v3  ;;  %3209 = vmatprep.subr.bf16.mxu1 %v3564_v9  ;;  %v847_v49 = vld [vmem:[%s4193_s26] sm:$0xff]  ;;  %v848_v60 = vld [vmem:[%s4193_s26 + $0x8] sm:$0xff] }
  0x39   : > { %v850_v51 = vmul.f32 %v849_v50, %v847_v49  ;;  %v851_v61 = vmul.f32 %v849_v50, %v848_v60 }
  0x3a   : > { %v858_v6 = vsel %vm857_vm1, %v855_v4, 0.0  ;;  %v861_v7 = vsel %vm857_vm1, %v856_v5, 0.0  ;;  %v846_v52 = vld [vmem:[%s4194_s1] sm:$0xff] }
  0x3b   : > { %859 = vadd.xlane.f32.xlu0 %v858_v6  ;;  %v3838_v53 = vadd.f32 %v850_v51, %v846_v52  ;;  %v3845_v62 = vadd.f32 %v851_v61, %v846_v52 }
  0x3f   : > { %862 = vadd.xlane.f32.xlu0 %v861_v7 }
  0xc8   : > { %v860_v11 = vpop.xlane.xlu0 %859 }
  0xc9   : > { %v865_v12 = vmul.f32 0.03125, %v860_v11 }
  0xcb   : > { %v867_v13 = vadd.f32 1e-06, %v865_v12 }
  0xcc   : > { %v863_v14 = vpop.xlane.xlu0 %862 }
  0xcd   : > { %3478 = vrsqrt.f32 %v867_v13  ;;  %v866_v15 = vmul.f32 0.03125, %v863_v14 }
  0xcf   : > { %v868_v16 = vadd.f32 1e-06, %v866_v15 }
  0xd1   : > { %3480 = vrsqrt.f32 %v868_v16 }
  0xd7   : > { %v3479_v17 = vpop.eup %3478 }
  0xd8   : > { %v871_v18 = vmul.f32 %v3479_v17, %v3761_v2 }
  0xda   : > { %v879_v22 = vmul.f32 %v3039_v20, %v871_v18 }
  0xdb   : > { %v3481_v19 = vpop.eup %3480 }
  0xdc   : > { %v872_v21 = vmul.f32 %v3481_v19, %v3763_v3 }
  0xde   : > { %v880_v23 = vmul.f32 %v3039_v20, %v872_v21 }
  0xe0   : > { %v881_v25 = vpack.c.bf16 %v880_v23, %v879_v22 }
  0xe2   : > { %3206 = vmatmul.mubr.msk.bf16.vlgmr.msra.gmra.mrb[0].mxu1 %vm857_vm1, %v881_v25 }
  0xe3   : > { %3210 = vmatpush3.bf16.msra.mxu1 %v3451_v24  ;;  %3213 = vmatprep.mubr.msk.bf16.mxu1 %vm3565_vm2, %v3564_v9  ;;  %v3456_v24 = vld [vmem:[%s3708_s22 + $0x8] sm:$0xff]  }
  0xe4   : > { %3211 = vmatprep.subr.bf16.mxu1 %v3564_v9 }
  0xe7   : > { %3212 = vmatpush3.bf16.msra.mxu1 %v3452_v26 }
  0xe8   : > { %3217 = vmatprep.subr.bf16.mxu1 %v3564_v9 }
  0xea   : > { %3214 = vmatmul.mubr.msk.bf16.vlgmr.msra.gmra.mrb[4].mxu1 %vm857_vm1, %v881_v25 }
  0xeb   : > { %3218 = vmatpush3.bf16.msra.mxu1 %v3453_v27  ;;  %3221 = vmatprep.mubr.msk.bf16.mxu1 %vm3565_vm2, %v3564_v9 }
  0xec   : > { %3219 = vmatprep.subr.bf16.mxu1 %v3564_v9 }
  0xef   : > { %3220 = vmatpush3.bf16.msra.mxu1 %v3454_v28 }
  0xf0   : > { %3225 = vmatprep.subr.bf16.mxu1 %v3564_v9 }
  0xf2   : > { %3222 = vmatmul.mubr.msk.bf16.vlgmr.msra.gmra.mrb[8].mxu1 %vm857_vm1, %v881_v25 }
  0xf3   : > { %3227 = vmatprep.mubr.msk.bf16.mxu1 %vm3565_vm2, %v3564_v9 }
 0x1b5   : > { %v935_v29 = vpop.f32.mrb[0].mxu1 }
 0x1b6   : > { %v3207_v30 = vpop.f32.mrb[1].mxu1 }
 0x1b7   : > { %v938_v31 = vpop.f32.mrb[2].mxu1  ;;  %v3867_v30 = vld [vmem:[%s3708_s22] sm:$0xff]  }
 0x1b8   : > { %v3805_v32 = vpack.c.bf16 %v938_v31, %v935_v29  ;;  %v3208_v33 = vpop.f32.mrb[3].mxu1 }
 0x1ba   : > { %v1383_v7 = vrot.slane %v3805_v32, 4 }
 0x1bd   : > { %v993_v34 = vpop.f32.mrb[4].mxu1 }
 0x1be   : > { %v3215_v35 = vpop.f32.mrb[5].mxu1 }
 0x1bf   : > { %v996_v36 = vpop.f32.mrb[6].mxu1 }
 0x1c0   : > { %v3807_v37 = vpack.c.bf16 %v996_v36, %v993_v34  ;;  %v3216_v38 = vpop.f32.mrb[7].mxu1 }
 0x1c2   : > { %1175 = vrot.lane.b32.xlu1 %v3807_v37, %s3566_s25  ;;  %v1068_v39 = vsel %vm1063_vm3, %v3807_v37, 0  ;;  %v1384_v19 = vrot.slane %v3807_v37, 4 }
 0x1c3   : > { %3226 = vmatpush3.bf16.xpose.msra.mxu1 %v1068_v39 }
 0x1c4   : > { %3237 = vmatprep.subr.bf16.mxu1 %v3564_v9 }
 0x1c5   : > { %v1051_v40 = vpop.f32.mrb[8].mxu1 }
 0x1c6   : > { %1172 = vrot.lane.b32.xlu1 %v3805_v32, %s3566_s25  ;;  %v3223_v41 = vpop.f32.mrb[9].mxu1 }
 0x1c7   : > { %v1054_v42 = vpop.f32.mrb[10].mxu1 }
 0x1c8   : > { %v3816_v43 = vpack.c.bf16 %v1054_v42, %v1051_v40  ;;  %v3224_v44 = vpop.f32.mrb[11].mxu1 }
 0x1ca   : > { %3228 = vmatmul.mubr.msk.bf16.vlgmr.msra.gmra.mrb[12].mxu1 %vm1063_vm3, %v3805_v32  ;;  %v1128_v45 = vsel %vm1126_vm4, %v3816_v43, 0  ;;  %v1443_v33 = vrot.slane %v3816_v43, 4 }
 0x1cb   : > { %3232 = vmatpush3.bf16.msra.mxu0 %v1128_v45  ;;  %3239 = vmatprep.mubr.msk.bf16.mxu1 %vm3565_vm2, %v3564_v9 }
 0x1cc   : > { %3243 = vmatprep.subr.bf16.mxu0 %v3564_v9  ;;  %v1448_v39 = vsel %vm1126_vm4, %v1443_v33, 0 }
 0x234   : > { %v1176_v46 = vpop.permute.xlu1 %1175 }
 0x235   : > { %v1181_v47 = vsel %vm1063_vm3, %v1176_v46, 0  ;;  %v1389_v46 = vsel %vm1063_vm3, %v1384_v19, 0 }
 0x236   : > { %3238 = vmatpush3.bf16.xpose.msra.mxu1 %v1181_v47 }
 0x237   : > { %3249 = vmatprep.subr.bf16.mxu1 %v3564_v9 }
 0x238   : > { %v1173_v48 = vpop.permute.xlu1 %1172 }
 0x23d   : > { %3240 = vmatmul.mubr.msk.bf16.vlgmr.msra.gmra.mrb[16].mxu1 %vm1063_vm3, %v1173_v48 }
 0x23e   : > { %3251 = vmatprep.mubr.msk.bf16.mxu1 %vm3565_vm2, %v3564_v9  ;;  %3250 = vmatpush3.bf16.msra.mxu1 %v3456_v24 }
 0x23f   : > { %3261 = vmatprep.subr.bf16.mxu1 %v3564_v9 }
 0x29d   : > { %v1104_v54 = vpop.f32.mrb[12].mxu1 }
 0x29e   : > { %v1105_v55 = vadd.f32 %v1104_v54, %v3838_v53  ;;  %v3229_v56 = vpop.f32.mrb[13].mxu1 }
 0x29f   : > { %v1107_v57 = vpop.f32.mrb[14].mxu1 }
 0x2a0   : > { %v3230_v58 = vpop.f32.mrb[15].mxu1  ;;  %v1111_v59 = vsel %vm1110_vm5, %v1105_v55, -inf }
 0x2a1   : > { %1112 = vmax.xlane.f32.xlu0 %v1111_v59 }
 0x310   : > { %v1217_v63 = vpop.f32.mrb[16].mxu1 }
 0x311   : > { %v1218_v0 = vadd.f32 %v1217_v63, %v3845_v62  ;;  %v3241_v1 = vpop.f32.mrb[17].mxu1 }
 0x312   : > { %v1220_v4 = vpop.f32.mrb[18].mxu1 }
 0x313   : > { %v3242_v5 = vpop.f32.mrb[19].mxu1  ;;  %v1223_v6 = vsel %vm1110_vm5, %v1218_v0, -inf }
 0x314   : > { %1224 = vmax.xlane.f32.xlu1 %v1223_v6 }
 0x325   : > { %1491 = vrot.lane.b32.xlu1 %v1383_v7, %s3566_s25 }
 0x32e   : > { %v1113_v8 = vpop.xlane.xlu0 %1112 }
 0x32f   : > { %v1114_v10 = vsub.f32 %v1105_v55, %v1113_v8 }
 0x331   : > { %v1115_v11 = vmul.f32 1.442695, %v1114_v10 }
 0x333   : > { %3482 = vpow2.f32 %v1115_v11 }
 0x33d   : > { %v3483_v12 = vpop.eup %3482 }
 0x33e   : > { %v1117_v13 = vsel %vm1110_vm5, %v3483_v12, 0.0 }
 0x33f   : > { %1118 = vadd.xlane.f32.xlu0 %v1117_v13 }
 0x3a1   : > { %v1225_v14 = vpop.xlane.xlu1 %1224 }
 0x3a2   : > { %v1226_v15 = vsub.f32 %v1218_v0, %v1225_v14 }
 0x3a4   : > { %v1227_v16 = vmul.f32 1.442695, %v1226_v15 }
 0x3a5   : > { %v1492_v49 = vpop.permute.xlu1 %1491 }
 0x3a6   : > { %3484 = vpow2.f32 %v1227_v16 }
 0x3b0   : > { %v3485_v17 = vpop.eup %3484 }
 0x3b1   : > { %v1229_v18 = vsel %vm1110_vm5, %v3485_v17, 0.0 }
 0x3b2   : > { %1230 = vadd.xlane.f32.xlu0 %v1229_v18 }
 0x3c8   : > { %1236 = vrot.lane.b32.xlu0 %v3816_v43, %s3566_s25 }
 0x3cc   : > { %v1119_v20 = vpop.xlane.xlu0 %1118  ;;  %1493 = vrot.lane.b32.xlu0 %v1384_v19, %s3566_s25 }
 0x3cd   : > { %3486 = vrcp.f32 %v1119_v20 }
 0x3d7   : > { %v3487_v21 = vpop.eup %3486 }
 0x3d8   : > { %v1121_v22 = vmul.f32 %v3487_v21, %v3483_v12 }
 0x3da   : > { %v1122_v23 = vpack.c.bf16 %v1121_v22, %v1121_v22 }
 0x3dc   : > { %3234 = vmatmul.mubr.msk.bf16.vlgmr.msra.gmra.mrb[0].mxu0 %vm1110_vm5, %v1122_v23 }
 0x3dd   : > { %3245 = vmatprep.mubr.msk.bf16.mxu0 %vm3565_vm2, %v3564_v9 }
 0x43f   : > { %v1231_v25 = vpop.xlane.xlu0 %1230 }
 0x440   : > { %3488 = vrcp.f32 %v1231_v25 }
 0x443   : > { %v1237_v26 = vpop.permute.xlu0 %1236 }
 0x444   : > { %v1242_v27 = vsel %vm1126_vm4, %v1237_v26, 0 }
 0x445   : > { %3244 = vmatpush3.bf16.msra.mxu0 %v1242_v27 }
 0x446   : > { %3255 = vmatprep.subr.bf16.mxu0 %v3564_v9 }
 0x447   : > { %v1494_v47 = vpop.permute.xlu0 %1493 }
 0x448   : > { %v1499_v48 = vsel %vm1063_vm3, %v1494_v47, 0 }
 0x44a   : > { %v3489_v28 = vpop.eup %3488 }
 0x44b   : > { %v1233_v29 = vmul.f32 %v3489_v28, %v3485_v17 }
 0x44d   : > { %v1234_v31 = vpack.c.bf16 %v1233_v29, %v1233_v29 }
 0x44f   : > { %3246 = vmatmul.mubr.msk.bf16.vlgmr.msra.gmra.mrb[4].mxu0 %vm1110_vm5, %v1234_v31 }
 0x450   : > { %3256 = vmatpush3.bf16.msra.mxu0 %v3867_v30  ;;  %3257 = vmatprep.mubr.msk.bf16.mxu0 %vm3565_vm2, %v3564_v9 }
 0x451   : > { %3267 = vmatprep.subr.bf16.mxu0 %v3564_v9 }
 0x4af   : > { %v1164_v34 = vpop.f32.mrb[0].mxu0 }
 0x4b0   : > { %v1170_v35 = vpack.c.bf16 %v1164_v34, %v1164_v34  ;;  %v3235_v36 = vpop.f32.mrb[1].mxu0 }
 0x4b1   : > { %v1167_v37 = vpop.f32.mrb[2].mxu0 }
 0x4b2   : > { %v3236_v38 = vpop.f32.mrb[3].mxu0  ;;  %3258 = vmatmul.mubr.msk.bf16.vlgmr.msra.gmra.mrb[8].mxu0 %vm1063_vm3, %v1170_v35 }
 0x4b3   : > { %3268 = vmatpush3.bf16.msra.mxu0 %v1448_v39  ;;  %3269 = vmatprep.mubr.msk.bf16.mxu0 %vm3565_vm2, %v3564_v9 }
 0x4b4   : > { %3279 = vmatprep.subr.bf16.mxu0 %v3564_v9 }
 0x522   : > { %v1278_v40 = vpop.f32.mrb[4].mxu0 }
 0x523   : > { %v1284_v41 = vpack.c.bf16 %v1278_v40, %v1278_v40  ;;  %v3247_v42 = vpop.f32.mrb[5].mxu0 }
 0x524   : > { %v1281_v44 = vpop.f32.mrb[6].mxu0 }
 0x525   : > { %v3248_v45 = vpop.f32.mrb[7].mxu0  ;;  %3252 = vmatmul.mubr.msk.bf16.vlgmr.msra.gmra.mrb[20].mxu1 %vm1063_vm3, %v1284_v41 }
 0x526   : > { %3262 = vmatpush3.bf16.xpose.msra.mxu1 %v1389_v46  ;;  %3263 = vmatprep.mubr.msk.bf16.mxu1 %vm3565_vm2, %v3564_v9 }
 0x527   : > { %3273 = vmatprep.subr.bf16.mxu1 %v3564_v9 }
 0x52d   : > { %3264 = vmatmul.mubr.msk.bf16.vlgmr.msra.gmra.mrb[24].mxu1 %vm1063_vm3, %v1383_v7 }
 0x52e   : > { %3274 = vmatpush3.bf16.xpose.msra.mxu1 %v1499_v48  ;;  %3275 = vmatprep.mubr.msk.bf16.mxu1 %vm3565_vm2, %v3564_v9 }
 0x52f   : > { %3285 = vmatprep.subr.bf16.mxu1 %v3564_v9 }
 0x535   : > { %3276 = vmatmul.mubr.msk.bf16.vlgmr.msra.gmra.mrb[28].mxu1 %vm1063_vm3, %v1492_v49 }
 0x536   : > { %3286 = vmatpush3.bf16.msra.mxu1 %v3456_v24  ;;  %3287 = vmatprep.mubr.msk.bf16.mxu1 %vm3565_vm2, %v3564_v9 }
 0x537   : > { %3297 = vmatprep.subr.bf16.mxu1 %v3564_v9 }
 0x585   : > { %v1377_v50 = vpop.f32.mrb[8].mxu0 }
 0x586   : > { %v3259_v51 = vpop.f32.mrb[9].mxu0 }
 0x587   : > { %v1380_v32 = vpop.f32.mrb[10].mxu0 }
 0x588   : > { %v3260_v52 = vpop.f32.mrb[11].mxu0 }
 0x5f8   : > { %v1328_v54 = vpop.f32.mrb[20].mxu1 }
 0x5f9   : > { %v1378_v55 = vadd.f32 %v1377_v50, %v1328_v54  ;;  %v3253_v56 = vpop.f32.mrb[21].mxu1  ;;  %v3457_v54 = vld [vmem:[%s3722_s28] sm:$0xff]  }
 0x5fa   : > { %v1331_v57 = vpop.f32.mrb[22].mxu1  ;;  %v3459_v56 = vld [vmem:[%s4195_s13] sm:$0xff]  }
 0x5fb   : > { %v3254_v58 = vpop.f32.mrb[23].mxu1  ;;  %v3901_v4 = vadd.f32 %v1378_v55, %v3761_v2  ;;  %v3458_v55 = vld [vmem:[%s3722_s28 + $0x8] sm:$0xff]  }
 0x5fc   : > { %v3461_v57 = vld [vmem:[%s3717_s3 + $0x8] sm:$0xff]  }
 0x600   : > { %v1425_v59 = vpop.f32.mrb[24].mxu1 }
 0x601   : > { %v1426_v60 = vadd.f32 %v1425_v59, %v3838_v53  ;;  %v3265_v61 = vpop.f32.mrb[25].mxu1  ;;  %v1691_v53 = vmul.f32 %v3901_v4, %v3901_v4 }
 0x602   : > { %v1428_v63 = vpop.f32.mrb[26].mxu1 }
 0x603   : > { %v3266_v0 = vpop.f32.mrb[27].mxu1  ;;  %v1431_v1 = vsel %vm1110_vm5, %v1426_v60, -inf  ;;  %v1693_v12 = vsel %vm857_vm1, %v1691_v53, 0.0 }
 0x604   : > { %1432 = vmax.xlane.f32.xlu0 %v1431_v1 }
 0x608   : > { %v1535_v5 = vpop.f32.mrb[28].mxu1 }
 0x609   : > { %v1536_v6 = vadd.f32 %v1535_v5, %v3845_v62  ;;  %v3277_v7 = vpop.f32.mrb[29].mxu1 }
 0x60a   : > { %v1538_v8 = vpop.f32.mrb[30].mxu1 }
 0x60b   : > { %v3278_v10 = vpop.f32.mrb[31].mxu1  ;;  %v1541_v11 = vsel %vm1110_vm5, %v1536_v6, -inf }
 0x60c   : > { %1542 = vmax.xlane.f32.xlu1 %v1541_v11 }
 0x610   : > { %1694 = vadd.xlane.f32.xlu1 %v1693_v12 }
 0x691   : > { %v1433_v13 = vpop.xlane.xlu0 %1432 }
 0x692   : > { %v1434_v14 = vsub.f32 %v1426_v60, %v1433_v13 }
 0x694   : > { %v1435_v15 = vmul.f32 1.442695, %v1434_v14 }
 0x696   : > { %3490 = vpow2.f32 %v1435_v15 }
 0x699   : > { %v1543_v2 = vpop.xlane.xlu1 %1542 }
 0x69a   : > { %v1544_v16 = vsub.f32 %v1536_v6, %v1543_v2 }
 0x69c   : > { %v1545_v17 = vmul.f32 1.442695, %v1544_v16 }
 0x69d   : > { %v1695_v58 = vpop.xlane.xlu1 %1694 }
 0x69e   : > { %3492 = vpow2.f32 %v1545_v17  ;;  %v1699_v59 = vmul.f32 0.03125, %v1695_v58 }
 0x6a0   : > { %v3491_v62 = vpop.eup %3490  ;;  %v1701_v60 = vadd.f32 1e-06, %v1699_v59  ;;  %v3465_v59 = vld [vmem:[%s3732_s4 + $0x8] sm:$0xff]  }
 0x6a1   : > { %v1437_v18 = vsel %vm1110_vm5, %v3491_v62, 0.0 }
 0x6a2   : > { %1438 = vadd.xlane.f32.xlu0 %v1437_v18 }
 0x6a8   : > { %v3493_v19 = vpop.eup %3492 }
 0x6a9   : > { %v1547_v20 = vsel %vm1110_vm5, %v3493_v19, 0.0 }
 0x6aa   : > { %1548 = vadd.xlane.f32.xlu0 %v1547_v20 }
 0x6c0   : > { %1553 = vrot.lane.b32.xlu0 %v1443_v33, %s3566_s25 }
 0x72f   : > { %v1439_v21 = vpop.xlane.xlu0 %1438 }
 0x730   : > { %3494 = vrcp.f32 %v1439_v21 }
 0x737   : > { %v1549_v22 = vpop.xlane.xlu0 %1548 }
 0x738   : > { %3496 = vrcp.f32 %v1549_v22 }
 0x739   : > { %3498 = vrsqrt.f32 %v1701_v60 }
 0x73a   : > { %v3495_v23 = vpop.eup %3494 }
 0x73b   : > { %v1441_v24 = vmul.f32 %v3495_v23, %v3491_v62  ;;  %v1554_v25 = vpop.permute.xlu0 %1553  ;;  %v3462_v23 = vld [vmem:[%s4197_s27] sm:$0xff]  }
 0x73c   : > { %v1559_v27 = vsel %vm1126_vm4, %v1554_v25, 0 }
 0x73d   : > { %v1442_v26 = vpack.c.bf16 %v1441_v24, %v1441_v24  ;;  %v3463_v24 = vld [vmem:[%s4197_s27 + $0x8] sm:$0xff]  }
 0x73f   : > { %3270 = vmatmul.mubr.msk.bf16.vlgmr.msra.gmra.mrb[12].mxu0 %vm1110_vm5, %v1442_v26 }
 0x740   : > { %3280 = vmatpush3.bf16.msra.mxu0 %v1559_v27  ;;  %3281 = vmatprep.mubr.msk.bf16.mxu0 %vm3565_vm2, %v3564_v9 }
 0x741   : > { %3291 = vmatprep.subr.bf16.mxu0 %v3564_v9 }
 0x742   : > { %v3497_v43 = vpop.eup %3496 }
 0x743   : > { %v1551_v28 = vmul.f32 %v3497_v43, %v3493_v19  ;;  %v3499_v1 = vpop.eup %3498 }
 0x744   : > { %v1705_v5 = vmul.f32 %v3499_v1, %v3901_v4 }
 0x745   : > { %v1552_v29 = vpack.c.bf16 %v1551_v28, %v1551_v28 }
 0x747   : > { %3282 = vmatmul.mubr.msk.bf16.vlgmr.msra.gmra.mrb[16].mxu0 %vm1110_vm5, %v1552_v29 }
 0x748   : > { %3292 = vmatpush3.bf16.msra.mxu0 %v3867_v30  ;;  %3293 = vmatprep.mubr.msk.bf16.mxu0 %vm3565_vm2, %v3564_v9 }
 0x749   : > { %3305 = vmatprep.subr.bf16.mxu0 %v3564_v9 }
 0x812   : > { %v1484_v31 = vpop.f32.mrb[12].mxu0 }
 0x813   : > { %v1490_v33 = vpack.c.bf16 %v1484_v31, %v1484_v31  ;;  %v3271_v34 = vpop.f32.mrb[13].mxu0 }
 0x814   : > { %v1487_v35 = vpop.f32.mrb[14].mxu0 }
 0x815   : > { %v3272_v36 = vpop.f32.mrb[15].mxu0  ;;  %3294 = vmatmul.mubr.msk.bf16.vlgmr.msra.gmra.mrb[20].mxu0 %vm1063_vm3, %v1490_v33 }
 0x816   : > { %3309 = vmatprep.mubr.msk.bf16.mxu0 %vm3565_vm2, %v3564_v9  ;;  %3306 = vmatpush3.bf16.msra.mxu0 %v3457_v54 }
 0x817   : > { %3307 = vmatprep.subr.bf16.mxu0 %v3564_v9 }
 0x81a   : > { %v1595_v37 = vpop.f32.mrb[16].mxu0  ;;  %3308 = vmatpush3.bf16.msra.mxu0 %v3458_v55 }
 0x81b   : > { %v1601_v38 = vpack.c.bf16 %v1595_v37, %v1595_v37  ;;  %v3283_v39 = vpop.f32.mrb[17].mxu0  ;;  %3321 = vmatprep.subr.bf16.mxu0 %v3564_v9 }
 0x81c   : > { %v1598_v40 = vpop.f32.mrb[18].mxu0 }
 0x81d   : > { %v3284_v30 = vpop.f32.mrb[19].mxu0  ;;  %3288 = vmatmul.mubr.msk.bf16.vlgmr.msra.gmra.mrb[32].mxu1 %vm1063_vm3, %v1601_v38  ;;  %3310 = vmatmul.mubr.msk.bf16.vlgmr.msra.gmra.mrb[24].mxu0 %vm857_vm1, %v3459_v56 }
 0x81e   : > { %3301 = vmatprep.mubr.msk.bf16.mxu1 %vm3565_vm2, %v3564_v9  ;;  %3323 = vmatprep.mubr.msk.bf16.mxu0 %vm3565_vm2, %v3564_v9 }
 0x8e8   : > { %v1682_v41 = vpop.f32.mrb[20].mxu0 }
 0x8e9   : > { %v3295_v42 = vpop.f32.mrb[21].mxu0 }
 0x8ea   : > { %v1685_v44 = vpop.f32.mrb[22].mxu0 }
 0x8eb   : > { %v3296_v45 = vpop.f32.mrb[23].mxu0 }
 0x8f0   : > { %v1639_v46 = vpop.f32.mrb[32].mxu1  ;;  %v1835_v12 = vpop.f32.mrb[24].mxu0 }
 0x8f1   : > { %v1683_v47 = vadd.f32 %v1682_v41, %v1639_v46  ;;  %v3289_v48 = vpop.f32.mrb[33].mxu1  ;;  %v3311_v13 = vpop.f32.mrb[25].mxu0 }
 0x8f2   : > { %v1642_v49 = vpop.f32.mrb[34].mxu1  ;;  %v1838_v14 = vpop.f32.mrb[26].mxu0 }
 0x8f3   : > { %v3930_v50 = vadd.f32 %v1683_v47, %v3763_v3  ;;  %v3290_v51 = vpop.f32.mrb[35].mxu1  ;;  %v3460_v3 = vld [vmem:[%s3717_s3] sm:$0xff]   ;;  %s4196_s3 = scalar_lea.vmem %s4154_s10, %s3683_s20  ;;  %v3959_v15 = vpack.c.bf16 %v1838_v14, %v1835_v12  ;;  %v3312_v2 = vpop.f32.mrb[27].mxu0 }
 0x8f4   : > { %3298 = vmatpush3.bf16.msra.mxu1 %v3460_v3  ;;  %v3063_v7 = vld [vmem:[%s4196_s3] ss:$0 sm:$0xff] }
 0x8f5   : > { %v1692_v32 = vmul.f32 %v3930_v50, %v3930_v50  ;;  %3299 = vmatprep.subr.bf16.mxu1 %v3564_v9  ;;  %v1713_v10 = vmul.f32 %v3063_v7, %v1705_v5  ;;  %v1909_v16 = vsel %vm1063_vm3, %v3959_v15, 0  ;;  %v2223_v37 = vrot.slane %v3959_v15, 4  ;;  %v4011_v5 = vld [vmem:[%s3732_s4] sm:$0xff]  }
 0x8f6   : > { %3322 = vmatpush3.bf16.xpose.msra.mxu0 %v1909_v16 }
 0x8f7   : > { %v1696_v52 = vsel %vm857_vm1, %v1692_v32, 0.0  ;;  %3333 = vmatprep.subr.bf16.mxu0 %v3564_v9 }
 0x8f8   : > { %1697 = vadd.xlane.f32.xlu1 %v1696_v52  ;;  %3300 = vmatpush3.bf16.msra.mxu1 %v3461_v57 }
 0x8f9   : > { %3313 = vmatprep.subr.bf16.mxu1 %v3564_v9 }
 0x909   : > { %2014 = vrot.lane.b32.xlu1 %v3959_v15, %s3566_s25 }
 0x985   : > { %v1698_v61 = vpop.xlane.xlu1 %1697 }
 0x986   : > { %v1700_v63 = vmul.f32 0.03125, %v1698_v61 }
 0x988   : > { %v1702_v0 = vadd.f32 1e-06, %v1700_v63 }
 0x989   : > { %v2015_v62 = vpop.permute.xlu1 %2014 }
 0x98a   : > { %3500 = vrsqrt.f32 %v1702_v0  ;;  %v2020_v22 = vsel %vm1063_vm3, %v2015_v62, 0 }
 0x994   : > { %v3501_v6 = vpop.eup %3500 }
 0x995   : > { %v1706_v8 = vmul.f32 %v3501_v6, %v3930_v50 }
 0x997   : > { %v1714_v11 = vmul.f32 %v3063_v7, %v1706_v8 }
 0x999   : > { %v1715_v53 = vpack.c.bf16 %v1714_v11, %v1713_v10 }
 0x99b   : > { %3302 = vmatmul.mubr.msk.bf16.vlgmr.msra.gmra.mrb[36].mxu1 %vm857_vm1, %v1715_v53 }
 0x99c   : > { %3317 = vmatprep.mubr.msk.bf16.mxu1 %vm3565_vm2, %v3564_v9  ;;  %3314 = vmatpush3.bf16.msra.mxu1 %v3462_v23 }
 0x99d   : > { %3315 = vmatprep.subr.bf16.mxu1 %v3564_v9 }
 0x9a0   : > { %3316 = vmatpush3.bf16.msra.mxu1 %v3463_v24 }
 0x9a1   : > { %3327 = vmatprep.subr.bf16.mxu1 %v3564_v9 }
 0x9a3   : > { %3318 = vmatmul.mubr.msk.bf16.vlgmr.msra.gmra.mrb[40].mxu1 %vm857_vm1, %v3459_v56 }
 0x9a4   : > { %3329 = vmatprep.mubr.msk.bf16.mxu1 %vm3565_vm2, %v3564_v9 }
 0xa6e   : > { %v1769_v17 = vpop.f32.mrb[36].mxu1 }
 0xa6f   : > { %v3303_v18 = vpop.f32.mrb[37].mxu1 }
 0xa70   : > { %v1772_v19 = vpop.f32.mrb[38].mxu1  ;;  %v2228_v18 = vsel %vm1063_vm3, %v2223_v37, 0 }
 0xa71   : > { %v3966_v20 = vpack.c.bf16 %v1772_v19, %v1769_v17  ;;  %v3304_v21 = vpop.f32.mrb[39].mxu1 }
 0xa73   : > { %2011 = vrot.lane.b32.xlu0 %v3966_v20, %s3566_s25  ;;  %3324 = vmatmul.mubr.msk.bf16.vlgmr.msra.gmra.mrb[28].mxu0 %vm1063_vm3, %v3966_v20  ;;  %v2222_v55 = vrot.slane %v3966_v20, 4 }
 0xa74   : > { %3334 = vmatpush3.bf16.xpose.msra.mxu0 %v2020_v22  ;;  %3335 = vmatprep.mubr.msk.bf16.mxu0 %vm3565_vm2, %v3564_v9 }
 0xa75   : > { %3345 = vmatprep.subr.bf16.mxu0 %v3564_v9 }
 0xa76   : > { %v1893_v30 = vpop.f32.mrb[40].mxu1 }
 0xa77   : > { %v3319_v41 = vpop.f32.mrb[41].mxu1 }
 0xa78   : > { %v1896_v42 = vpop.f32.mrb[42].mxu1 }
 0xa79   : > { %v3992_v44 = vpack.c.bf16 %v1896_v42, %v1893_v30  ;;  %v3320_v45 = vpop.f32.mrb[43].mxu1 }
 0xa7b   : > { %v1967_v48 = vsel %vm1126_vm4, %v3992_v44, 0  ;;  %v2282_v7 = vrot.slane %v3992_v44, 4 }
 0xa7c   : > { %3328 = vmatpush3.bf16.msra.mxu1 %v1967_v48 }
 0xa7d   : > { %3339 = vmatprep.subr.bf16.mxu1 %v3564_v9  ;;  %v2287_v13 = vsel %vm1126_vm4, %v2282_v7, 0 }
 0xae5   : > { %v2012_v25 = vpop.permute.xlu0 %2011 }
 0xae6   : > { %3336 = vmatmul.mubr.msk.bf16.vlgmr.msra.gmra.mrb[32].mxu0 %vm1063_vm3, %v2012_v25 }
 0xae7   : > { %3347 = vmatprep.mubr.msk.bf16.mxu0 %vm3565_vm2, %v3564_v9  ;;  %3346 = vmatpush3.bf16.msra.mxu0 %v3465_v59 }
 0xae8   : > { %3357 = vmatprep.subr.bf16.mxu0 %v3564_v9 }
 0xb46   : > { %v1945_v26 = vpop.f32.mrb[28].mxu0 }
 0xb47   : > { %v3325_v27 = vpop.f32.mrb[29].mxu0  ;;  %v1951_v43 = vsel %vm1110_vm5, %v1945_v26, -inf }
 0xb48   : > { %1952 = vmax.xlane.f32.xlu0 %v1951_v43  ;;  %v1948_v28 = vpop.f32.mrb[30].mxu0 }
 0xb49   : > { %v3326_v29 = vpop.f32.mrb[31].mxu0 }
 0xbb9   : > { %v2056_v31 = vpop.f32.mrb[32].mxu0 }
 0xbba   : > { %v3337_v33 = vpop.f32.mrb[33].mxu0  ;;  %v2062_v34 = vsel %vm1110_vm5, %v2056_v31, -inf }
 0xbbb   : > { %2063 = vmax.xlane.f32.xlu1 %v2062_v34  ;;  %v2059_v35 = vpop.f32.mrb[34].mxu0 }
 0xbbc   : > { %v3338_v36 = vpop.f32.mrb[35].mxu0 }
 0xbcc   : > { %2332 = vrot.lane.b32.xlu1 %v2223_v37, %s3566_s25 }
 0xbd5   : > { %v1953_v38 = vpop.xlane.xlu0 %1952 }
 0xbd6   : > { %v1954_v39 = vsub.f32 %v1945_v26, %v1953_v38 }
 0xbd8   : > { %v1955_v40 = vmul.f32 1.442695, %v1954_v39 }
 0xbda   : > { %3502 = vpow2.f32 %v1955_v40 }
 0xbe4   : > { %v3503_v46 = vpop.eup %3502 }
 0xbe5   : > { %v1957_v47 = vsel %vm1110_vm5, %v3503_v46, 0.0 }
 0xbe6   : > { %1958 = vadd.xlane.f32.xlu0 %v1957_v47 }
 0xc48   : > { %v2064_v49 = vpop.xlane.xlu1 %2063 }
 0xc49   : > { %v2065_v51 = vsub.f32 %v2056_v31, %v2064_v49 }
 0xc4b   : > { %v2066_v32 = vmul.f32 1.442695, %v2065_v51 }
 0xc4c   : > { %v2333_v19 = vpop.permute.xlu1 %2332 }
 0xc4d   : > { %3504 = vpow2.f32 %v2066_v32  ;;  %v2338_v20 = vsel %vm1063_vm3, %v2333_v19, 0 }
 0xc57   : > { %v3505_v52 = vpop.eup %3504 }
 0xc58   : > { %v2068_v54 = vsel %vm1110_vm5, %v3505_v52, 0.0 }
 0xc59   : > { %2069 = vadd.xlane.f32.xlu0 %v2068_v54 }
 0xc6f   : > { %2075 = vrot.lane.b32.xlu0 %v3992_v44, %s3566_s25 }
 0xc73   : > { %v1959_v56 = vpop.xlane.xlu0 %1958  ;;  %2330 = vrot.lane.b32.xlu0 %v2222_v55, %s3566_s25 }
 0xc74   : > { %3506 = vrcp.f32 %v1959_v56 }
 0xc7e   : > { %v3507_v3 = vpop.eup %3506 }
 0xc7f   : > { %v1961_v57 = vmul.f32 %v3507_v3, %v3503_v46 }
 0xc81   : > { %v1962_v58 = vpack.c.bf16 %v1961_v57, %v1961_v57 }
 0xc83   : > { %3330 = vmatmul.mubr.msk.bf16.vlgmr.msra.gmra.mrb[44].mxu1 %vm1110_vm5, %v1962_v58 }
 0xc84   : > { %3341 = vmatprep.mubr.msk.bf16.mxu1 %vm3565_vm2, %v3564_v9 }
 0xce6   : > { %v2070_v60 = vpop.xlane.xlu0 %2069 }
 0xce7   : > { %3508 = vrcp.f32 %v2070_v60 }
 0xcea   : > { %v2076_v61 = vpop.permute.xlu0 %2075 }
 0xceb   : > { %v2081_v63 = vsel %vm1126_vm4, %v2076_v61, 0 }
 0xcec   : > { %3340 = vmatpush3.bf16.msra.mxu1 %v2081_v63 }
 0xced   : > { %3351 = vmatprep.subr.bf16.mxu1 %v3564_v9 }
 0xcee   : > { %v2331_v15 = vpop.permute.xlu0 %2330 }
 0xcf1   : > { %v3509_v0 = vpop.eup %3508 }
 0xcf2   : > { %v2072_v1 = vmul.f32 %v3509_v0, %v3505_v52 }
 0xcf4   : > { %v2073_v6 = vpack.c.bf16 %v2072_v1, %v2072_v1 }
 0xcf6   : > { %3342 = vmatmul.mubr.msk.bf16.vlgmr.msra.gmra.mrb[48].mxu1 %vm1110_vm5, %v2073_v6 }
 0xcf7   : > { %3352 = vmatpush3.bf16.msra.mxu1 %v4011_v5  ;;  %3353 = vmatprep.mubr.msk.bf16.mxu1 %vm3565_vm2, %v3564_v9 }
 0xcf8   : > { %3363 = vmatprep.subr.bf16.mxu1 %v3564_v9 }
 0xd56   : > { %v2003_v8 = vpop.f32.mrb[44].mxu1 }
 0xd57   : > { %v2009_v10 = vpack.c.bf16 %v2003_v8, %v2003_v8  ;;  %v3331_v11 = vpop.f32.mrb[45].mxu1 }
 0xd58   : > { %v2006_v53 = vpop.f32.mrb[46].mxu1 }
 0xd59   : > { %v3332_v12 = vpop.f32.mrb[47].mxu1  ;;  %3354 = vmatmul.mubr.msk.bf16.vlgmr.msra.gmra.mrb[52].mxu1 %vm1063_vm3, %v2009_v10 }
 0xd5a   : > { %3364 = vmatpush3.bf16.msra.mxu1 %v2287_v13  ;;  %3365 = vmatprep.mubr.msk.bf16.mxu1 %vm3565_vm2, %v3564_v9 }
 0xd5b   : > { %3375 = vmatprep.subr.bf16.mxu1 %v3564_v9 }
 0xdc9   : > { %v2117_v14 = vpop.f32.mrb[48].mxu1 }
 0xdca   : > { %v2123_v2 = vpack.c.bf16 %v2117_v14, %v2117_v14  ;;  %v3343_v16 = vpop.f32.mrb[49].mxu1 }
 0xdcb   : > { %v2120_v17 = vpop.f32.mrb[50].mxu1 }
 0xdcc   : > { %v3344_v62 = vpop.f32.mrb[51].mxu1  ;;  %3348 = vmatmul.mubr.msk.bf16.vlgmr.msra.gmra.mrb[36].mxu0 %vm1063_vm3, %v2123_v2 }
 0xdcd   : > { %3358 = vmatpush3.bf16.xpose.msra.mxu0 %v2228_v18  ;;  %3359 = vmatprep.mubr.msk.bf16.mxu0 %vm3565_vm2, %v3564_v9 }
 0xdce   : > { %3369 = vmatprep.subr.bf16.mxu0 %v3564_v9 }
 0xdd4   : > { %3360 = vmatmul.mubr.msk.bf16.vlgmr.msra.gmra.mrb[40].mxu0 %vm1063_vm3, %v2222_v55 }
 0xdd5   : > { %3370 = vmatpush3.bf16.xpose.msra.mxu0 %v2338_v20  ;;  %3371 = vmatprep.mubr.msk.bf16.mxu0 %vm3565_vm2, %v3564_v9 }
 0xdd6   : > { %3381 = vmatprep.subr.bf16.mxu0 %v3564_v9 }
 0xddc   : > { %3372 = vmatmul.mubr.msk.bf16.vlgmr.msra.gmra.mrb[44].mxu0 %vm1063_vm3, %v2331_v15 }
 0xddd   : > { %3382 = vmatpush3.bf16.msra.mxu0 %v3465_v59  ;;  %3383 = vmatprep.mubr.msk.bf16.mxu0 %vm3565_vm2, %v3564_v9 }
 0xdde   : > { %3393 = vmatprep.subr.bf16.mxu0 %v3564_v9 }
 0xe2c   : > { %v2216_v21 = vpop.f32.mrb[52].mxu1 }
 0xe2d   : > { %v3355_v22 = vpop.f32.mrb[53].mxu1 }
 0xe2e   : > { %v2219_v23 = vpop.f32.mrb[54].mxu1 }
 0xe2f   : > { %v3356_v24 = vpop.f32.mrb[55].mxu1  ;;  %v3466_v23 = vld [vmem:[%s3741_s7] sm:$0xff]  }
 0xe30   : > { %v3467_v24 = vld [vmem:[%s3746_s8] sm:$0xff]  }
 0xe9f   : > { %v2167_v25 = vpop.f32.mrb[36].mxu0 }
 0xea0   : > { %v2217_v26 = vadd.f32 %v2216_v21, %v2167_v25  ;;  %v3349_v27 = vpop.f32.mrb[37].mxu0  ;;  %v3468_v25 = vld [vmem:[%s3741_s7 + $0x8] sm:$0xff]  }
 0xea1   : > { %v2170_v43 = vpop.f32.mrb[38].mxu0 }
 0xea2   : > { %v3350_v28 = vpop.f32.mrb[39].mxu0  ;;  %v4045_v49 = vadd.f32 %v2217_v26, %v3901_v4  ;;  %v3469_v26 = vld [vmem:[%s3746_s8 + $0x8] sm:$0xff]   ;;  %s4198_s8 = sld [smem:[#allocation12_spill]] (!%p3103_p6) }
 0xea4   : > { %v2530_v52 = vmul.f32 %v4045_v49, %v4045_v49 }
 0xea6   : > { %v2532_v54 = vsel %vm857_vm1, %v2530_v52, 0.0 }
 0xea7   : > { %v2264_v29 = vpop.f32.mrb[40].mxu0 }
 0xea8   : > { %v3361_v31 = vpop.f32.mrb[41].mxu0  ;;  %v2270_v33 = vsel %vm1110_vm5, %v2264_v29, -inf }
 0xea9   : > { %2271 = vmax.xlane.f32.xlu1 %v2270_v33  ;;  %v2267_v34 = vpop.f32.mrb[42].mxu0 }
 0xeaa   : > { %v3362_v35 = vpop.f32.mrb[43].mxu0 }
 0xeaf   : > { %v2374_v36 = vpop.f32.mrb[44].mxu0 }
 0xeb0   : > { %v3373_v37 = vpop.f32.mrb[45].mxu0  ;;  %v2380_v38 = vsel %vm1110_vm5, %v2374_v36, -inf }
 0xeb1   : > { %2381 = vmax.xlane.f32.xlu0 %v2380_v38  ;;  %v2377_v39 = vpop.f32.mrb[46].mxu0 }
 0xeb2   : > { %v3374_v40 = vpop.f32.mrb[47].mxu0 }
 0xeb3   : > { %v3470_v40 = vld [vmem:[%s3752_s9] sm:$0xff]  }
 0xeba   : > { %2392 = vrot.lane.b32.xlu1 %v2282_v7, %s3566_s25 }
 0xf36   : > { %v2272_v30 = vpop.xlane.xlu1 %2271 }
 0xf37   : > { %v2273_v41 = vsub.f32 %v2264_v29, %v2272_v30 }
 0xf39   : > { %v2274_v42 = vmul.f32 1.442695, %v2273_v41  ;;  %v3471_v41 = vld [vmem:[%s3752_s9 + $0x8] sm:$0xff]  }
 0xf3a   : > { %v2393_v58 = vpop.permute.xlu1 %2392 }
 0xf3b   : > { %3510 = vpow2.f32 %v2274_v42  ;;  %v2398_v4 = vsel %vm1126_vm4, %v2393_v58, 0  ;;  %v3472_v42 = vld [vmem:[%s3752_s9 + $0x10] sm:$0xff]  }
 0xf3e   : > { %v2382_v44 = vpop.xlane.xlu0 %2381 }
 0xf3f   : > { %v2383_v45 = vsub.f32 %v2374_v36, %v2382_v44  ;;  %v3088_v36 = vld [vmem:[%s815_s6] ss:$0 sm:$0xff]  ;;  %v3473_v44 = vld [vmem:[%s3752_s9 + $0x18] sm:$0xff]  }
 0xf41   : > { %v2384_v46 = vmul.f32 1.442695, %v2383_v45  ;;  %v3474_v45 = vld [vmem:[%s3752_s9 + $0x20] sm:$0xff]  }
 0xf43   : > { %3512 = vpow2.f32 %v2384_v46  ;;  %v3475_v46 = vld [vmem:[%s3752_s9 + $0x28] sm:$0xff]  }
 0xf45   : > { %v3511_v47 = vpop.eup %3510 }
 0xf46   : > { %v2276_v48 = vsel %vm1110_vm5, %v3511_v47, 0.0 }
 0xf47   : > { %2277 = vadd.xlane.f32.xlu0 %v2276_v48  ;;  %v3477_v48 = vld [vmem:[%s3752_s9 + $0x38] sm:$0xff]  }
 0xf4d   : > { %v3513_v51 = vpop.eup %3512 }
 0xf4e   : > { %v2386_v32 = vsel %vm1110_vm5, %v3513_v51, 0.0 }
 0xf4f   : > { %2387 = vadd.xlane.f32.xlu0 %v2386_v32 }
 0xf53   : > { %2533 = vadd.xlane.f32.xlu0 %v2532_v54 }
 0xfd4   : > { %v2278_v55 = vpop.xlane.xlu0 %2277 }
 0xfd5   : > { %3514 = vrcp.f32 %v2278_v55 }
 0xfdc   : > { %v2388_v56 = vpop.xlane.xlu0 %2387 }
 0xfdd   : > { %3516 = vrcp.f32 %v2388_v56 }
 0xfdf   : > { %v3515_v3 = vpop.eup %3514 }
 0xfe0   : > { %v2280_v57 = vmul.f32 %v3515_v3, %v3511_v47  ;;  %v3476_v47 = vld [vmem:[%s3752_s9 + $0x30] sm:$0xff]  }
 0xfe2   : > { %v2281_v59 = vpack.c.bf16 %v2280_v57, %v2280_v57 }
 0xfe4   : > { %3366 = vmatmul.mubr.msk.bf16.vlgmr.msra.gmra.mrb[56].mxu1 %vm1110_vm5, %v2281_v59 }
 0xfe5   : > { %3376 = vmatpush3.bf16.msra.mxu1 %v2398_v4  ;;  %3377 = vmatprep.mubr.msk.bf16.mxu1 %vm3565_vm2, %v3564_v9 }
 0xfe6   : > { %3387 = vmatprep.subr.bf16.mxu1 %v3564_v9 }
 0xfe7   : > { %v3517_v60 = vpop.eup %3516 }
 0xfe8   : > { %v2390_v61 = vmul.f32 %v3517_v60, %v3513_v51 }
 0xfea   : > { %v2391_v63 = vpack.c.bf16 %v2390_v61, %v2390_v61 }
 0xfec   : > { %3378 = vmatmul.mubr.msk.bf16.vlgmr.msra.gmra.mrb[60].mxu1 %vm1110_vm5, %v2391_v63 }
 0xfed   : > { %3388 = vmatpush3.bf16.msra.mxu1 %v4011_v5  ;;  %3389 = vmatprep.mubr.msk.bf16.mxu1 %vm3565_vm2, %v3564_v9 }
 0xfee   : > { %3401 = vmatprep.subr.bf16.mxu1 %v3564_v9 }
0x10b7   : > { %v2323_v0 = vpop.f32.mrb[56].mxu1 }
0x10b8   : > { %v2329_v1 = vpack.c.bf16 %v2323_v0, %v2323_v0  ;;  %v3367_v6 = vpop.f32.mrb[57].mxu1 }
0x10b9   : > { %v2326_v7 = vpop.f32.mrb[58].mxu1 }
0x10ba   : > { %v3368_v8 = vpop.f32.mrb[59].mxu1  ;;  %3390 = vmatmul.mubr.msk.bf16.vlgmr.msra.gmra.mrb[64].mxu1 %vm1063_vm3, %v2329_v1 }
0x10bb   : > { %3405 = vmatprep.mubr.msk.bf16.mxu1 %vm3565_vm2, %v3564_v9  ;;  %3402 = vmatpush3.bf16.msra.mxu1 %v3467_v24 }
0x10bc   : > { %3403 = vmatprep.subr.bf16.mxu1 %v3564_v9 }
0x10bf   : > { %v2434_v10 = vpop.f32.mrb[60].mxu1  ;;  %3404 = vmatpush3.bf16.msra.mxu1 %v3469_v26 }
0x10c0   : > { %v2440_v11 = vpack.c.bf16 %v2434_v10, %v2434_v10  ;;  %v3379_v53 = vpop.f32.mrb[61].mxu1 }
0x10c1   : > { %v2437_v12 = vpop.f32.mrb[62].mxu1 }
0x10c2   : > { %v3380_v5 = vpop.f32.mrb[63].mxu1  ;;  %3384 = vmatmul.mubr.msk.bf16.vlgmr.msra.gmra.mrb[48].mxu0 %vm1063_vm3, %v2440_v11 }
0x10c3   : > { %3397 = vmatprep.mubr.msk.bf16.mxu0 %vm3565_vm2, %v3564_v9  ;;  %3394 = vmatpush3.bf16.msra.mxu0 %v3466_v23 }
0x10c4   : > { %3395 = vmatprep.subr.bf16.mxu0 %v3564_v9 }
0x10c7   : > { %3396 = vmatpush3.bf16.msra.mxu0 %v3468_v25 }
0x10c8   : > { %3409 = vmatprep.subr.bf16.mxu0 %v3564_v9 }
0x118d   : > { %v2521_v13 = vpop.f32.mrb[64].mxu1 }
0x118e   : > { %v3391_v14 = vpop.f32.mrb[65].mxu1 }
0x118f   : > { %v2524_v2 = vpop.f32.mrb[66].mxu1 }
0x1190   : > { %v3392_v16 = vpop.f32.mrb[67].mxu1 }
0x1195   : > { %v2478_v17 = vpop.f32.mrb[48].mxu0 }
0x1196   : > { %v2522_v62 = vadd.f32 %v2521_v13, %v2478_v17  ;;  %v3385_v18 = vpop.f32.mrb[49].mxu0  ;;  %v3104_v17 = vld [vmem:[%s4198_s8] ss:$0 sm:$0xff] (!%p3103_p6) }
0x1197   : > { %v2481_v19 = vpop.f32.mrb[50].mxu0 }
0x1198   : > { %v4068_v20 = vadd.f32 %v2522_v62, %v3930_v50  ;;  %v3386_v15 = vpop.f32.mrb[51].mxu0  ;;  %v2534_v50 = vpop.xlane.xlu0 %2533 }
0x1199   : > { %v2538_v27 = vmul.f32 0.03125, %v2534_v50 }
0x119a   : > { %v2531_v21 = vmul.f32 %v4068_v20, %v4068_v20 }
0x119b   : > { %v2540_v43 = vadd.f32 1e-06, %v2538_v27 }
0x119c   : > { %v2535_v22 = vsel %vm857_vm1, %v2531_v21, 0.0 }
0x119d   : > { %2536 = vadd.xlane.f32.xlu0 %v2535_v22  ;;  %3518 = vrsqrt.f32 %v2540_v43 }
0x11a7   : > { %v3519_v33 = vpop.eup %3518 }
0x11a8   : > { %v2544_v34 = vmul.f32 %v3519_v33, %v4045_v49 }
0x11aa   : > { %v2552_v39 = vmul.f32 %v3088_v36, %v2544_v34 }
0x122a   : > { %v2537_v28 = vpop.xlane.xlu0 %2536 }
0x122b   : > { %v2539_v29 = vmul.f32 0.03125, %v2537_v28 }
0x122d   : > { %v2541_v31 = vadd.f32 1e-06, %v2539_v29 }
0x122f   : > { %3520 = vrsqrt.f32 %v2541_v31 }
0x1239   : > { %v3521_v35 = vpop.eup %3520 }
0x123a   : > { %v2545_v37 = vmul.f32 %v3521_v35, %v4068_v20 }
0x123c   : > { %v2553_v38 = vmul.f32 %v3088_v36, %v2545_v37 }
0x123e   : > { %v2554_v30 = vpack.c.bf16 %v2553_v38, %v2552_v39 }
0x1240   : > { %3398 = vmatmul.mubr.msk.bf16.vlgmr.msra.gmra.mrb[52].mxu0 %vm857_vm1, %v2554_v30  ;;  %3406 = vmatmul.mubr.msk.bf16.vlgmr.msra.gmra.mrb[68].mxu1 %vm857_vm1, %v2554_v30 }
0x1241   : > { %3410 = vmatpush3.bf16.msra.mxu0 %v3470_v40  ;;  %3425 = vmatprep.mubr.msk.bf16.mxu0 %vm3565_vm2, %v3564_v9 }
0x1242   : > { %3411 = vmatprep.subr.bf16.mxu0 %v3564_v9 }
0x1245   : > { %3412 = vmatpush3.bf16.msra.mxu0 %v3471_v41 }
0x1246   : > { %3413 = vmatprep.subr.bf16.mxu0 %v3564_v9 }
0x1249   : > { %3414 = vmatpush3.bf16.msra.mxu0 %v3472_v42 }
0x124a   : > { %3415 = vmatprep.subr.bf16.mxu0 %v3564_v9 }
0x124d   : > { %3416 = vmatpush3.bf16.msra.mxu0 %v3473_v44 }
0x124e   : > { %3417 = vmatprep.subr.bf16.mxu0 %v3564_v9 }
0x1251   : > { %3418 = vmatpush3.bf16.msra.mxu0 %v3474_v45 }
0x1252   : > { %3419 = vmatprep.subr.bf16.mxu0 %v3564_v9 }
0x1255   : > { %3420 = vmatpush3.bf16.msra.mxu0 %v3475_v46 }
0x1256   : > { %3421 = vmatprep.subr.bf16.mxu0 %v3564_v9 }
0x1259   : > { %3422 = vmatpush3.bf16.msra.mxu0 %v3476_v47 }
0x125a   : > { %3423 = vmatprep.subr.bf16.mxu0 %v3564_v9 }
0x125d   : > { %3424 = vmatpush3.bf16.msra.mxu0 %v3477_v48 }
0x1313   : > { %v2608_v51 = vpop.f32.mrb[52].mxu0  ;;  %v2667_v32 = vpop.f32.mrb[68].mxu1 }
0x1314   : > { %v2615_v52 = vmax.f32 %v2608_v51, 0.0  ;;  %v3399_v54 = vpop.f32.mrb[53].mxu0  ;;  %v3407_v55 = vpop.f32.mrb[69].mxu1 }
0x1315   : > { %v2611_v56 = vpop.f32.mrb[54].mxu0  ;;  %v2670_v3 = vpop.f32.mrb[70].mxu1 }
0x1316   : > { %v2674_v57 = vmul.f32 %v2667_v32, %v2615_v52  ;;  %v2616_v58 = vmax.f32 %v2611_v56, 0.0  ;;  %v3400_v59 = vpop.f32.mrb[55].mxu0  ;;  %v3408_v4 = vpop.f32.mrb[71].mxu1 }
0x1318   : > { %v2675_v60 = vmul.f32 %v2670_v3, %v2616_v58 }
0x131a   : > { %v2676_v61 = vpack.c.bf16 %v2675_v60, %v2674_v57 }
0x131c   : > { %3426 = vmatmul.mubr.bf16.vlgmr.msra.gmra.mrb[56].mxu0 %v2676_v61 }
0x13ee   : > { %2789 = sbr.rel (%p3103_p6) target bundleno = 5275 (0x149b), region = 104 }
0x13ef   : > { %v2775_v63 = vpop.f32.mrb[56].mxu0 }
0x13f0   : > { %v2782_v0 = vadd.f32 %v2775_v63, %v4045_v49  ;;  %v3427_v9 = vpop.f32.mrb[57].mxu0 }
0x13f1   : > { %v2778_v1 = vpop.f32.mrb[58].mxu0 }
0x13f2   : > { %2784 = vst.msk [vmem:[#allocation2] sm:$0xff] %vm857_vm1, %v2782_v0  ;;  %v2783_v6 = vadd.f32 %v2778_v1, %v4068_v20  ;;  %v3428_v7 = vpop.f32.mrb[59].mxu0  ;;  %v2791_v8 = vmul.f32 (!%p3103_p6), %v2782_v0, %v2782_v0 }
0x13f4   : > { %2785 = vst.msk [vmem:[#allocation2 + $0x8] sm:$0xff] %vm857_vm1, %v2783_v6  ;;  %v2792_v10 = vmul.f32 (!%p3103_p6), %v2783_v6, %v2783_v6  ;;  %v2793_v11 = vsel (!%p3103_p6), %vm857_vm1, %v2791_v8, 0.0 }
0x13f5   : > { %2794 = vadd.xlane.f32.xlu0 %v2793_v11 }
0x13f6   : > { %v2796_v53 = vsel %vm857_vm1, %v2792_v10, 0.0 }
0x13f9   : > { %2797 = vadd.xlane.f32.xlu0 %v2796_v53 }
0x1482   : > { %v2795_v49 = vpop.xlane.xlu0 %2794 }
0x1483   : > { %v2799_v12 = vmul.f32 0.03125, %v2795_v49 }
0x1485   : > { %v2801_v5 = vadd.f32 1e-06, %v2799_v12 }
0x1486   : > { %v2798_v13 = vpop.xlane.xlu0 %2797 }
0x1487   : > { %3522 = vrsqrt.f32 %v2801_v5  ;;  %v2800_v14 = vmul.f32 0.03125, %v2798_v13 }
0x1489   : > { %v2802_v2 = vadd.f32 1e-06, %v2800_v14 }
0x148b   : > { %3524 = vrsqrt.f32 %v2802_v2 }
0x1491   : > { %v3523_v16 = vpop.eup %3522 }
0x1492   : > { %v2805_v62 = vmul.f32 %v3523_v16, %v2782_v0 }
0x1494   : > { %v2813_v18 = vmul.f32 %v3104_v17, %v2805_v62 }
0x1495   : > { %v3525_v19 = vpop.eup %3524 }
0x1496   : > { %2815 = vst.msk [vmem:[#allocation3] sm:$0xff] %vm857_vm1, %v2813_v18  ;;  %v2806_v20 = vmul.f32 %v3525_v19, %v2783_v6 }
0x1498   : > { %v2814_v15 = vmul.f32 %v3104_v17, %v2806_v20 }
0x149a   : > { %2816 = vst.msk [vmem:[#allocation3 + $0x8] sm:$0xff] %vm857_vm1, %v2814_v15 }
0x149b PF: > { %p3433_p7 = scmp.eq.s32.totalorder %s3676_s30, 1  ;;  %s3567_s9 = smov [#allocation3]  }
0x149c   : > { %s2823_s25 = sshll.u32 %s3567_s9, 4  ;;  %s2824_s25 = int_to_ptr.vmem [resolvable:$true] %s2823_s25 }
0x149d   : > { %s3526_s21 = scalar_lea.vmem %s2824_s25, 256  ;;  %p3533_p11 = scmp.lt.s32.totalorder %s2824_s25, %s2824_s25 }
0x149e   : > { %p3527_p8 = scmp.ne.s32.totalorder %s2824_s25, %s3526_s21  ;;  %p3534_p12 = scmp.lt.s32.totalorder %s3526_s21, %s3526_s21 }
0x14a0   : > { %p3528_p9 = pnand %p3527_p8, %p3433_p7  ;;  %p3535_p13 = por %p3534_p12, %p3533_p11 }
0x14a2   : > { %p3529_p10 = pneg %p3528_p9 }
0x14a4   : > { %p3536_p0 = pnand %p3535_p13, %p3529_p10 }
0x14a6   : > { %3539 = shalt.err (!%p3536_p0)
}
0x14a7   : > { %s4199_s23 = sld [smem:[#allocation20_spill]] }
0x14ad   : > { %s3540_s1 = scalar_lea.hbm %s4199_s23, 256 }
0x14ae   : > { %p3541_p1 = scmp.ne.s32.totalorder %s4199_s23, %s3540_s1  ;;  %p3546_p4 = scmp.lt.u32.totalorder %s3540_s1, %s4199_s23 }
0x14b0   : > { %p3542_p2 = pnand %p3541_p1, %p3433_p7 }
0x14b2   : > { %p3543_p3 = pneg %p3542_p2 }
0x14b4   : > { %p3548_p5 = pnand %p3546_p4, %p3543_p3 }
0x14b6   : > { %3551 = shalt.err (!%p3548_p5)
}
0x14b7   : > { %s3568_s13 = smov 128   ;;  %s3569_s28 = smov 8  }
0x14b8   : > { %3430 = dma.vmem_to_hbm [thread:$0]  (%p3433_p7), %s2824_s25, 256, %s4199_s23, [#allocation4], %s3568_s13, %s3568_s13, %s3569_s28  }
0x14b9   : > { %3557 = dma.done.wait (%p3433_p7), [#allocation4], 256  }
0x14ba   : > { %3559 = vsyncadd (%p3433_p7), [#allocation4], 4294967040 }
0x14bb PF: > { %s4200_s27 = sld [smem:[#allocation6_spill]] }
0x14c1   : > { %s30_s0 = sadd.s32 1, %s4200_s27  }
0x14c2   : > { %p27_p6 = scmp.ge.s32.totalorder %s30_s0, 4  }
0x14c4   :  { %29 = sbr.rel (!%p27_p6) target bundleno = 15 (0xf), region = 170 }
0x14cb   :  { %2839 = vsyncpa [#allocation4], 1 }
0x14cc   :  { %2841 = vsyncpa [#allocation4 + $0x1], 1 }

</bundles_post_ra>
